<compile_context>
chip_gen: v7x
topology: tpu7x:2x2x1
jax: 0.10.0
libtpu: 0.0.40
codegen_flags: <defaults>
</compile_context>

<pallas_src>
import jax
import jax.numpy as jnp
from jax.experimental import pallas as pl
from jax.experimental.pallas import tpu as pltpu


def _round_up(x, m):
    return ((x + m - 1) // m) * m


def _pad2d(a, rows, cols):
    return jnp.pad(a, ((0, rows - a.shape[0]), (0, cols - a.shape[1])))


def finetune_kernel(x_ref, w_feat_ref, b_feat_ref, w_cls_ref, y_ref, f_acc_ref):
    # grid = (n_feat halves [parallel], K chunks [arbitrary / reduction])
    k = pl.program_id(1)
    tk = w_feat_ref.shape[0]

    @pl.when(k == 0)
    def _():
        f_acc_ref[...] = jnp.zeros_like(f_acc_ref)

    # Feature stand-in: bf16 inputs, f32 accumulation on the MXU.
    # x stays resident in VMEM; slice this step's K chunk in-kernel.
    start = pl.multiple_of(k * tk, tk)
    x_chunk = x_ref[:, pl.ds(start, tk)]
    f_acc_ref[...] += jnp.dot(x_chunk, w_feat_ref[...],
                              preferred_element_type=jnp.float32)

    @pl.when(k == pl.num_programs(1) - 1)
    def _():
        # This half's features (+ bias half), then partial classifier logits.
        f = (f_acc_ref[...] + b_feat_ref[...]).astype(jnp.bfloat16)
        y = jnp.dot(f, w_cls_ref[...], preferred_element_type=jnp.float32)
        y_ref[...] = y.astype(y_ref.dtype)


def prepare_params(w_feat, b_feat, w_cls, b_cls, *, tk=2048, n_split=2):
    """Pad + cast parameters ONCE (cache the returned device arrays)."""
    d_in, n_feat = w_feat.shape
    n_out = w_cls.shape[1]

    n_feat_pad = _round_up(n_feat, 128 * n_split)      # 1000 -> 1024
    n_out_pad = _round_up(n_out, 128)                  # 7    -> 128
    tk_eff = min(tk, _round_up(d_in, 128))             # multiple of 128
    d_in_pad = _round_up(d_in, tk_eff)

    w_feat_p = _pad2d(w_feat, d_in_pad, n_feat_pad).astype(jnp.bfloat16)
    b_feat_p = _pad2d(b_feat.reshape(1, n_feat), 1, n_feat_pad).astype(jnp.float32)
    w_cls_p = _pad2d(w_cls, n_feat_pad, n_out_pad).astype(jnp.bfloat16)
    b_cls_p = _pad2d(b_cls.reshape(1, n_out), 1, n_out_pad).astype(jnp.float32)

    meta = dict(d_in=d_in, d_in_pad=d_in_pad, n_feat=n_feat,
                n_feat_pad=n_feat_pad, n_out=n_out, n_out_pad=n_out_pad,
                tk=tk_eff, n_split=n_split)
    return (w_feat_p, b_feat_p, w_cls_p, b_cls_p), meta


def finetune_forward(x_nchw, params, meta):
    w_feat_p, b_feat_p, w_cls_p, b_cls_p = params
    d_in_pad = meta["d_in_pad"]
    n_feat_pad = meta["n_feat_pad"]
    n_out_pad = meta["n_out_pad"]
    tk = meta["tk"]
    n_j = meta["n_split"]
    n_feat_half = n_feat_pad // n_j
    n_k = d_in_pad // tk

    B = x_nchw.shape[0]
    x_flat = x_nchw.reshape(B, -1)                     # f.view(B, -1) flatten
    assert x_flat.shape[1] == meta["d_in"]

    b_pad = _round_up(B, 16)                           # full bf16 sublane packing
    x_p = _pad2d(x_flat, b_pad, d_in_pad).astype(jnp.bfloat16)

    flops = (2 * b_pad * d_in_pad * n_feat_pad
             + 2 * b_pad * n_feat_pad * n_out_pad)
    bytes_accessed = (x_p.size * 2 + w_feat_p.size * 2 + b_feat_p.size * 4
                      + w_cls_p.size * 2 + n_j * b_pad * n_out_pad * 4)

    partials = pl.pallas_call(
        finetune_kernel,
        out_shape=jax.ShapeDtypeStruct((n_j, b_pad, n_out_pad), jnp.float32),
        grid_spec=pltpu.PrefetchScalarGridSpec(
            num_scalar_prefetch=0,
            grid=(n_j, n_k),
            in_specs=[
                # x: fully resident, single DMA (constant block index).
                pl.BlockSpec((b_pad, d_in_pad), lambda j, k: (0, 0)),
                # w_feat: stream (tk, n_feat_half) blocks; dominant HBM traffic.
                pl.BlockSpec((tk, n_feat_half), lambda j, k: (k, j)),
                # b_feat: this half's bias.
                pl.BlockSpec((1, n_feat_half), lambda j, k: (0, j)),
                # w_cls: this half's classifier rows (bf16).
                pl.BlockSpec((n_feat_half, n_out_pad), lambda j, k: (j, 0)),
            ],
            out_specs=pl.BlockSpec((None, b_pad, n_out_pad),
                                   lambda j, k: (j, 0, 0)),
            scratch_shapes=[pltpu.VMEM((b_pad, n_feat_half), jnp.float32)],
        ),
        compiler_params=pltpu.CompilerParams(
            # feature halves are independent (megacore on v7x); K is a reduction.
            dimension_semantics=("parallel", "arbitrary")),
        cost_estimate=pl.CostEstimate(
            flops=flops, transcendentals=0, bytes_accessed=bytes_accessed),
    )(x_p, w_feat_p, b_feat_p, w_cls_p)

    # Sum the per-half partial logits (exact) and add the classifier bias.
    y_full = partials.sum(axis=0) + b_cls_p
    return y_full[:B, :meta["n_out"]]


if __name__ == "__main__":
    # Small shapes consistent with the module: NCHW image input, 1000-d
    # backbone feature vector, 7-way classifier output.
    B, C, H, W = 2, 4, 16, 16
    D_IN = C * H * W        # 1024
    N_FEAT = 1000
    N_OUT = 7

    key = jax.random.PRNGKey(0)
    kx, kwf, kbf, kwc, kbc = jax.random.split(key, 5)

    x = jax.random.normal(kx, (B, C, H, W), dtype=jnp.float32)

    # Deterministic synthetic parameters (no checkpoint load).
    w_feat = jax.random.normal(kwf, (D_IN, N_FEAT), dtype=jnp.float32) * 0.02
    b_feat = jax.random.normal(kbf, (1, N_FEAT), dtype=jnp.float32) * 0.02
    w_cls = jax.random.normal(kwc, (N_FEAT, N_OUT), dtype=jnp.float32) * 0.02
    b_cls = jax.random.normal(kbc, (1, N_OUT), dtype=jnp.float32) * 0.02

    # Pad / cast parameters once (cached device arrays), then run the kernel.
    params, meta = prepare_params(w_feat, b_feat, w_cls, b_cls)
    y = finetune_forward(x, params, meta)
    jax.block_until_ready(y)

    # Cross-check against plain f32 JAX reference (kernel uses bf16 operands
    # with f32 accumulation -> small relative deviation).
    f_ref = x.reshape(B, -1) @ w_feat + b_feat
    y_ref = f_ref @ w_cls + b_cls
    assert y.shape == (B, N_OUT)
    assert jnp.allclose(y, y_ref, atol=3e-2, rtol=3e-2), (
        f"max abs err {jnp.max(jnp.abs(y - y_ref))}")

    print("KERNEL_OK")
</pallas_src>

<mosaic_0001>
module attributes {stable_mosaic.version = 11 : i64} {
  func.func @finetune_kernel(%arg0: i32, %arg1: i32, %arg2: memref<16x1024xbf16, #tpu.memory_space<vmem>>, %arg3: memref<1024x512xbf16, #tpu.memory_space<vmem>>, %arg4: memref<1x512xf32, #tpu.memory_space<vmem>>, %arg5: memref<512x128xbf16, #tpu.memory_space<vmem>>, %arg6: memref<1x16x128xf32, #tpu.memory_space<vmem>>, %arg7: memref<16x512xf32, #tpu.memory_space<vmem>>) attributes {dimension_semantics = [#tpu.dimension_semantics<parallel>, #tpu.dimension_semantics<arbitrary>], iteration_bounds = array<i64: 2, 1>, scalar_prefetch = 0 : i64, scratch_operands = 1 : i64, tpu.core_type = #tpu.core_type<tc>, window_params = [{pipeline_mode = #tpu.pipeline_mode<synchronous>, transform_indices = @transform_0, window_bounds = array<i64: 16, 1024>}, {transform_indices = @transform_1, window_bounds = array<i64: 1024, 512>}, {transform_indices = @transform_2, window_bounds = array<i64: 1, 512>}, {transform_indices = @transform_3, window_bounds = array<i64: 512, 128>}, {transform_indices = @transform_4, window_bounds = array<i64: 1, 16, 128>}]} {
    %c0_i32 = arith.constant 0 : i32
    %0 = arith.cmpi eq, %arg1, %c0_i32 : i32
    %1 = arith.extui %0 : i1 to i32
    %c0_i32_0 = arith.constant 0 : i32
    %2 = arith.cmpi ne, %1, %c0_i32_0 : i32
    scf.if %2 {
      %cst_9 = arith.constant 0.000000e+00 : f32
      %15 = vector.broadcast %cst_9 : f32 to vector<16x512xf32>
      %c0_10 = arith.constant 0 : index
      %c0_11 = arith.constant 0 : index
      %16 = vector.load %arg7[%c0_10, %c0_11] : memref<16x512xf32, #tpu.memory_space<vmem>>, vector<16x512xf32>
      tpu.vector_store %arg7[%c0_10, %c0_11], %15 {strides = array<i32>} : memref<16x512xf32, #tpu.memory_space<vmem>>, vector<16x512xf32>,
    } else {
    }
    %c1024_i32 = arith.constant 1024 : i32
    %3 = arith.muli %arg1, %c1024_i32 : i32
    %4 = tpu.assume_multiple %3, 1024 : i32
    %c0 = arith.constant 0 : index
    %5 = arith.index_cast %4 : i32 to index
    %6 = vector.load %arg2[%c0, %5] : memref<16x1024xbf16, #tpu.memory_space<vmem>>, vector<16x1024xbf16>
    %c0_1 = arith.constant 0 : index
    %c0_2 = arith.constant 0 : index
    %7 = vector.load %arg7[%c0_1, %c0_2] : memref<16x512xf32, #tpu.memory_space<vmem>>, vector<16x512xf32>
    %c0_3 = arith.constant 0 : index
    %c0_4 = arith.constant 0 : index
    %8 = vector.load %arg3[%c0_3, %c0_4] : memref<1024x512xbf16, #tpu.memory_space<vmem>>, vector<1024x512xbf16>
    %cst = arith.constant dense<0.000000e+00> : vector<16x512xf32>
    %9 = tpu.matmul %6, %8, %cst {dimension_numbers = #tpu.dot_dimension_numbers<[1], [0], [0], [1], [0, 0, 1, 1], [], []>} : vector<16x1024xbf16>, vector<1024x512xbf16>, vector<16x512xf32> -> vector<16x512xf32>
    %10 = arith.addf %7, %9 : vector<16x512xf32>
    %c0_5 = arith.constant 0 : index
    %c0_6 = arith.constant 0 : index
    %11 = vector.load %arg7[%c0_5, %c0_6] : memref<16x512xf32, #tpu.memory_space<vmem>>, vector<16x512xf32>
    tpu.vector_store %arg7[%c0_5, %c0_6], %10 {strides = array<i32>} : memref<16x512xf32, #tpu.memory_space<vmem>>, vector<16x512xf32>,
    %c0_i32_7 = arith.constant 0 : i32
    %12 = arith.cmpi eq, %arg1, %c0_i32_7 : i32
    %13 = arith.extui %12 : i1 to i32
    %c0_i32_8 = arith.constant 0 : i32
    %14 = arith.cmpi ne, %13, %c0_i32_8 : i32
    scf.if %14 {
      %c0_9 = arith.constant 0 : index
      %c0_10 = arith.constant 0 : index
      %15 = vector.load %arg7[%c0_9, %c0_10] : memref<16x512xf32, #tpu.memory_space<vmem>>, vector<16x512xf32>
      %c0_11 = arith.constant 0 : index
      %c0_12 = arith.constant 0 : index
      %16 = vector.load %arg4[%c0_11, %c0_12] : memref<1x512xf32, #tpu.memory_space<vmem>>, vector<1x512xf32>
      %17 = vector.broadcast %16 : vector<1x512xf32> to vector<16x512xf32>
      %18 = arith.addf %15, %17 : vector<16x512xf32>
      %19 = arith.truncf %18 : vector<16x512xf32> to vector<16x512xbf16>
      %c0_13 = arith.constant 0 : index
      %c0_14 = arith.constant 0 : index
      %20 = vector.load %arg5[%c0_13, %c0_14] : memref<512x128xbf16, #tpu.memory_space<vmem>>, vector<512x128xbf16>
      %cst_15 = arith.constant dense<0.000000e+00> : vector<16x128xf32>
      %21 = tpu.matmul %19, %20, %cst_15 {dimension_numbers = #tpu.dot_dimension_numbers<[1], [0], [0], [1], [0, 0, 1, 1], [], []>} : vector<16x512xbf16>, vector<512x128xbf16>, vector<16x128xf32> -> vector<16x128xf32>
      %c0_16 = arith.constant 0 : index
      %c0_17 = arith.constant 0 : index
      %c0_18 = arith.constant 0 : index
      %22 = vector.load %arg6[%c0_16, %c0_17, %c0_18] : memref<1x16x128xf32, #tpu.memory_space<vmem>>, vector<1x16x128xf32>
      %23 = vector.shape_cast %22 : vector<1x16x128xf32> to vector<16x128xf32>
      %24 = vector.shape_cast %21 : vector<16x128xf32> to vector<1x16x128xf32>
      tpu.vector_store %arg6[%c0_16, %c0_17, %c0_18], %24 {strides = array<i32>} : memref<1x16x128xf32, #tpu.memory_space<vmem>>, vector<1x16x128xf32>,
    } else {
    }
    return
  }
  func.func @transform_0(%arg0: i32, %arg1: i32) -> (i32, i32) {
    %c0_i32 = arith.constant 0 : i32
    %c0_i32_0 = arith.constant 0 : i32
    %c0_i32_1 = arith.constant 0 : i32
    return %c0_i32, %c0_i32_0 : i32, i32
  }
  func.func @transform_1(%arg0: i32, %arg1: i32) -> (i32, i32) {
    %c0_i32 = arith.constant 0 : i32
    return %arg1, %arg0 : i32, i32
  }
  func.func @transform_2(%arg0: i32, %arg1: i32) -> (i32, i32) {
    %c0_i32 = arith.constant 0 : i32
    %c0_i32_0 = arith.constant 0 : i32
    return %c0_i32, %arg0 : i32, i32
  }
  func.func @transform_3(%arg0: i32, %arg1: i32) -> (i32, i32) {
    %c0_i32 = arith.constant 0 : i32
    %c0_i32_0 = arith.constant 0 : i32
    return %arg0, %c0_i32 : i32, i32
  }
  func.func @transform_4(%arg0: i32, %arg1: i32) -> (i32, i32, i32) {
    %c0_i32 = arith.constant 0 : i32
    %c0_i32_0 = arith.constant 0 : i32
    %c0_i32_1 = arith.constant 0 : i32
    return %arg0, %c0_i32, %c0_i32_0 : i32, i32, i32
  }
}

</mosaic_0001>

<bundles_post_ra>
// kernel: tpu_custom_call.1
= control target key start
LH: loop header
LB: loop body
LE: loop exit
PB: predicated region body
PF: predicated region fallthrough
CT: control target
= control target key end

     0   :  { %s4613_s0 = inlined_call_operand.hbm [shape: bf16[16,1024], index: 0, kind: input, shape index: {}]   ;;  %s4614_s1 = inlined_call_operand.hbm [shape: bf16[1024,1024], index: 1, kind: input, shape index: {}]   ;;  %s4615_s2 = inlined_call_operand.hbm [shape: f32[1,1024], index: 2, kind: input, shape index: {}]   ;;  %s4616_s3 = inlined_call_operand.hbm [shape: bf16[1024,128], index: 3, kind: input, shape index: {}]   ;;  %s4617_s4 = inlined_call_operand.hbm [shape: f32[2,16,128], index: 4, kind: output, shape index: {}]  }
   0x1   :  { %4632 = sst [smem:[#allocation20_spill]] %s4614_s1 }
   0x2   :  { %9 = vsyncpa [#allocation4], 0 }
   0x3   :  { %10 = vsyncpa [#allocation7], 0 }
   0x4   :  { %12 = vsyncpa [#allocation7 + $0x1], 0 }
   0x5   :  { %13 = vsyncpa [#allocation10], 0 }
   0x6   :  { %15 = vsyncpa [#allocation10 + $0x1], 0 }
   0x7   :  { %16 = vsyncpa [#allocation5], 0 }
   0x8   :  { %18 = vsyncpa [#allocation5 + $0x1], 0  ;;  %s3985_s15 = smov 0   ;;  %s3987_s16 = smov 0  }
   0x9   :  { %s3989_s17 = smov 0   ;;  %s3991_s18 = smov 0  }
   0xa   :  { %s3993_s19 = smov 0   ;;  %s3995_s20 = smov 0  }
   0xb LB: > { %4633 = sst [smem:[#allocation16_spill]] %s3933_s17  ;;  %s36_s21 = sadd.s32 1, %s3941_s19  ;;  %s3945_s20 = sphi %s3995_s20, %s24_s20   ;;  %s3941_s19 = sphi %s3993_s19, %s4664_s19   ;;  %s3937_s18 = sphi %s3991_s18, %s4663_s18   ;;  %s3933_s17 = sphi %s3989_s17, %s4659_s17   ;;  %s3929_s16 = sphi %s3987_s16, %s4662_s16   ;;  %s3925_s15 = sphi %s3985_s15, %s4661_s15  }
   0xc   : > { %4634 = sst [smem:[#allocation17_spill]] %s3945_s20  ;;  %s66_s22 = sadd.s32 1, %s3933_s17 }
   0xd   : > { %p38_p0 = scmp.ge.s32.totalorder %s36_s21, 2  ;;  %p4618_p1 = scmp.ne.s32.totalorder %s3933_s17, %s3929_s16 }
   0xe   : > { %p74_p2 = scmp.eq.s32.totalorder %s3945_s20, 0  ;;  %p3261_p5 = scmp.lt.s32.totalorder %s3945_s20, 2 }
   0xf   : > { %s4666_s21 = smov (%p38_p0, %s36_s21), 0  ;;  %s194_s25 = sand.u32 1, %s3945_s20  }
  0x10   : > { %4635 = sst [smem:[#allocation18_spill]] %s4666_s21  ;;  %p4025_p3 = por %p74_p2, %p4618_p1 }
  0x11   : > { %s62_s24 = ssub.s32 %s3941_s19, %s4666_s21  ;;  %s4035_s26 = sand.u32 1, %s3933_s17  }
  0x12   : > { %p64_p6 = scmp.eq.s32.totalorder %s62_s24, 0  ;;  %s2842_s28 = sshll.u32 %s4035_s26, 11 }
  0x13   : > { %s3158_s29 = sshll.u32 %s3941_s19, 8  ;;  %s4638_s1 = sld [smem:[#allocation20_spill]] }
  0x14   : > { %s4038_s27 = scalar_select %p64_p6, %s3933_s17, %s66_s22  }
  0x15   : > { %s198_s7 = scalar_lea.vmem [#allocation6], %s2842_s28  ;;  %p4049_p7 = pnand %p3261_p5, %p4025_p3 }
  0x16   : > { %4637 = sst [smem:[#allocation19_spill]] %s4038_s27  ;;  %s208_s8 = sshll.u32 %s198_s7, 4  ;;  %s4053_s8 = int_to_ptr.vmem [resolvable:$true] %s208_s8 }
  0x17   : > { %s4639_s9 = scalar_select %p4049_p7, 1, 0 }
  0x18   : > { %s4055_s10 = scalar_lea.sflag [#allocation7], %s194_s25  ;;  %p4061_p9 = pneg %p4049_p7 }
  0x19   : > { %s4045_s6 = scalar_lea.hbm %s4638_s1, %s3158_s29  ;;  %s3742_s22 = scalar_lea.hbm %s4638_s1, 65536 }
  0x1a   : > { %s3737_s11 = scalar_lea.hbm %s4045_s6, 32768  ;;  %p3743_p12 = scmp.lt.u32.totalorder %s4045_s6, %s4638_s1 }
  0x1b   : > { %p3738_p8 = scmp.ne.s32.totalorder %s4045_s6, %s3737_s11  ;;  %p3744_p13 = scmp.lt.u32.totalorder %s3742_s22, %s3737_s11 }
  0x1c   : > { %s4640_s12 = scalar_select %p4061_p9, 1, 0 }
  0x1d   : > { %p3740_p10 = pnand %p4061_p9, %p3738_p8  ;;  %p3745_p0 = por %p3744_p13, %p3743_p12 }
  0x1e   : > { %p3746_p2 = scmp.lt.u32.totalorder %s3737_s11, %s4045_s6 }
  0x1f   : > { %p3741_p11 = pneg %p3740_p10 }
  0x20   : > { %p3747_p3 = por %p3746_p2, %p3745_p0 }
  0x22   : > { %p3748_p5 = pnand %p3747_p3, %p3741_p11 }
  0x24   : > { %3751 = shalt.err (!%p3748_p5)
}
  0x25   : > { %s3752_s25 = scalar_lea.vmem %s4053_s8, 32768  ;;  %s3947_s28 = smov [#allocation6]  }
  0x26   : > { %p3753_p6 = scmp.ne.s32.totalorder %s4053_s8, %s3752_s25  ;;  %s3757_s29 = sshll.u32 %s3947_s28, 4  ;;  %s3758_s29 = int_to_ptr.vmem [resolvable:$false] %s3757_s29 }
  0x27   : > { %s3759_s30 = scalar_lea.vmem %s3758_s29, 65536  ;;  %p3760_p4 = scmp.lt.s32.totalorder %s4053_s8, %s3758_s29 }
  0x28   : > { %p3755_p8 = pnand %p3753_p6, %p4061_p9  ;;  %p3761_p1 = scmp.lt.s32.totalorder %s3759_s30, %s3752_s25 }
  0x2a   : > { %p3756_p10 = pneg %p3755_p8  ;;  %p3762_p12 = por %p3761_p1, %p3760_p4 }
  0x2c   : > { %p3763_p13 = pnand %p3762_p12, %p3756_p10 }
  0x2e   : > { %3766 = shalt.err (!%p3763_p13)
}
  0x2f   : > { %s4619_s5 = smov 512   ;;  %s3949_s7 = smov 256  }
  0x30   : > { %s3950_s11 = smov 16   ;;  %s4087_s13 = sadd.s32 4294967295, %s3945_s20  }
  0x31   : > { %3249 = dma.hbm_to_vmem [thread:$0]  (!%p4049_p7), %s4045_s6, 32768, %s4053_s8, %s4055_s10, %s4619_s5, %s3949_s7, %s3950_s11  }
  0x32   : > { %s2838_s14 = sadd.s32 4294967294, %s3945_s20   ;;  %p79_p1 = scmp.ne.s32.totalorder %s3929_s16, %s3925_s15 }
  0x33   : > { %p4624_p4 = scmp.eq.s32.totalorder %s4087_s13, 0  ;;  %p155_p11 = scmp.eq.s32.totalorder %s4087_s13, 1 }
  0x34   : > { %p161_p0 = scmp.eq.s32.totalorder %s2838_s14, 1  ;;  %p2839_p3 = scmp.ge.s32.totalorder %s3945_s20, 1 }
  0x35   : > { %p4096_p2 = por %p4624_p4, %p79_p1  ;;  %p4642_p5 = scmp.ne.s32.totalorder %s3933_s17, %s3929_s16 }
  0x36   : > { %p4108_p8 = por %p161_p0, %p79_p1  ;;  %p168_p10 = scmp.lt.s32.totalorder %s3945_s20, 3 }
  0x37   : > { %s4641_s22 = scalar_select %p4096_p2, 1, 0 }
  0x38   : > { %p4104_p6 = por %p155_p11, %p4642_p5  ;;  %p4113_p12 = pnand %p2839_p3, %p168_p10 }
  0x39   : > { %s4644_s8 = scalar_select %p4108_p8, 1, 0 }
  0x3a   : > { %s4643_s6 = scalar_select %p4104_p6, 1, 0 }
  0x3b   : > { %s4645_s23 = scalar_select %p4113_p12, 1, 0 }
  0x3c   : > { %s3951_s24 = smov [#allocation3]   ;;  %s2845_s28 = sshll.u32 %s4035_s26, 2 }
  0x3d   : > { %s180_s25 = sshll.u32 %s3951_s24, 4  ;;  %p3242_p13 = pneg %p4113_p12  ;;  %s4117_s25 = int_to_ptr.vmem [resolvable:$true] %s180_s25 }
  0x3e   : > { %s3159_s29 = sshll.u32 %s3941_s19, 6  ;;  %s222_s30 = scalar_lea.vmem [#allocation8], %s2845_s28 }
  0x3f   : > { %s230_s7 = sshll.u32 %s222_s30, 4  ;;  %p4125_p1 = pnand %p3242_p13, %p4624_p4  ;;  %s4134_s7 = int_to_ptr.vmem [resolvable:$true] %s230_s7 }
  0x40   : > { %s4132_s1 = scalar_lea.hbm %s4615_s2, %s3159_s29  ;;  %s2848_s24 = sshll.u32 %s4035_s26, 8 }
  0x41   : > { %s3767_s17 = scalar_lea.hbm %s4613_s0, 1024  ;;  %p3769_p0 = pneg %p4125_p1 }
  0x42   : > { %p3768_p11 = scmp.ne.s32.totalorder %s4613_s0, %s3767_s17  ;;  %p3774_p10 = scmp.lt.u32.totalorder %s3767_s17, %s4613_s0 }
  0x44   : > { %p3770_p3 = pnand %p3769_p0, %p3768_p11 }
  0x46   : > { %p3771_p5 = pneg %p3770_p3 }
  0x48   : > { %p3776_p13 = pnand %p3774_p10, %p3771_p5 }
  0x4a   : > { %3779 = shalt.err (!%p3776_p13)
}
  0x4b   : > { %s3780_s29 = scalar_lea.vmem %s4117_s25, 1024  ;;  %p3788_p2 = scmp.lt.s32.totalorder %s4117_s25, %s4117_s25 }
  0x4c   : > { %p3781_p4 = scmp.ne.s32.totalorder %s4117_s25, %s3780_s29  ;;  %p3789_p12 = scmp.lt.s32.totalorder %s3780_s29, %s3780_s29 }
  0x4e   : > { %p3783_p8 = pnand %p3781_p4, %p3769_p0  ;;  %p3790_p7 = por %p3789_p12, %p3788_p2 }
  0x50   : > { %p3784_p6 = pneg %p3783_p8 }
  0x52   : > { %p3791_p9 = pnand %p3790_p7, %p3784_p6 }
  0x54   : > { %3794 = shalt.err (!%p3791_p9)
}
  0x55   : > { %s3952_s21 = smov 32   ;;  %s4647_s20 = smov 512  }
  0x56   : > { %3245 = dma.hbm_to_vmem [thread:$0]  (!%p4125_p1), %s4613_s0, 1024, %s4117_s25, [#allocation4], %s4647_s20, %s4647_s20, %s3952_s21  }
  0x57   : > { %s3795_s14 = scalar_lea.hbm %s4132_s1, 64  ;;  %p4648_p2 = scmp.ne.s32.totalorder %s4640_s12, 0 }
  0x58   : > { %p3796_p4 = scmp.ne.s32.totalorder %s4132_s1, %s3795_s14  ;;  %s3800_s11 = scalar_lea.hbm %s4615_s2, 128 }
  0x59   : > { %p3801_p6 = scmp.lt.u32.totalorder %s4132_s1, %s4615_s2  ;;  %p3802_p8 = scmp.lt.u32.totalorder %s3800_s11, %s3795_s14 }
  0x5a   : > { %p3798_p7 = pnand %p3796_p4, %p4648_p2  ;;  %p3804_p11 = scmp.lt.u32.totalorder %s3795_s14, %s4132_s1 }
  0x5b   : > { %p3803_p12 = por %p3802_p8, %p3801_p6 }
  0x5c   : > { %p3799_p9 = pneg %p3798_p7 }
  0x5d   : > { %p3805_p0 = por %p3804_p11, %p3803_p12 }
  0x5f   : > { %p3806_p3 = pnand %p3805_p0, %p3799_p9 }
  0x61   : > { %3809 = shalt.err (!%p3806_p3)
}
  0x62   : > { %s3810_s25 = scalar_lea.vmem %s4134_s7, 64  ;;  %s3953_s21 = smov [#allocation8]  }
  0x63   : > { %p3811_p1 = scmp.ne.s32.totalorder %s4134_s7, %s3810_s25  ;;  %s3815_s20 = sshll.u32 %s3953_s21, 4  ;;  %s3816_s20 = int_to_ptr.vmem [resolvable:$false] %s3815_s20 }
  0x64   : > { %s3817_s17 = scalar_lea.vmem %s3816_s20, 128  ;;  %p3818_p13 = scmp.lt.s32.totalorder %s4134_s7, %s3816_s20 }
  0x65   : > { %p3813_p5 = pnand %p3811_p1, %p4648_p2  ;;  %p3819_p4 = scmp.lt.s32.totalorder %s3817_s17, %s3810_s25 }
  0x67   : > { %p3814_p10 = pneg %p3813_p5  ;;  %p3820_p7 = por %p3819_p4, %p3818_p13 }
  0x69   : > { %p3821_p6 = pnand %p3820_p7, %p3814_p10 }
  0x6b   : > { %3824 = shalt.err (!%p3821_p6)
}
  0x6c   : > { %p4649_p9 = scmp.ne.s32.totalorder %s4639_s9, 0  ;;  %s3160_s27 = sshll.u32 %s3941_s19, 12 }
  0x6d   : > { %s4186_s30 = scalar_lea.hbm %s4616_s3, %s3160_s27  ;;  %s241_s11 = scalar_lea.vmem [#allocation9], %s2848_s24 }
  0x6e   : > { %3252 = dma.hbm_to_vmem [thread:$0]  (!%p4649_p9), %s4132_s1, 64, %s4134_s7, %s4055_s10  }
  0x6f   : > { %s248_s5 = sshll.u32 %s241_s11, 4  ;;  %s238_s29 = scalar_lea.sflag [#allocation10], %s4035_s26  ;;  %s4190_s5 = int_to_ptr.vmem [resolvable:$true] %s248_s5 }
  0x70   : > { %s3825_s25 = scalar_lea.hbm %s4186_s30, 4096  ;;  %s3830_s7 = scalar_lea.hbm %s4616_s3, 8192 }
  0x71   : > { %p3826_p8 = scmp.ne.s32.totalorder %s4186_s30, %s3825_s25  ;;  %p3831_p0 = scmp.lt.u32.totalorder %s4186_s30, %s4616_s3 }
  0x72   : > { %p3832_p3 = scmp.lt.u32.totalorder %s3830_s7, %s3825_s25  ;;  %p3834_p5 = scmp.lt.u32.totalorder %s3825_s25, %s4186_s30 }
  0x73   : > { %p3828_p12 = pnand %p3826_p8, %p4648_p2 }
  0x74   : > { %p3833_p1 = por %p3832_p3, %p3831_p0 }
  0x75   : > { %p3829_p11 = pneg %p3828_p12 }
  0x76   : > { %p3835_p10 = por %p3834_p5, %p3833_p1 }
  0x78   : > { %p3836_p13 = pnand %p3835_p10, %p3829_p11 }
  0x7a   : > { %3839 = shalt.err (!%p3836_p13)
}
  0x7b   : > { %s3840_s24 = scalar_lea.vmem %s4190_s5, 4096  ;;  %s3954_s17 = smov [#allocation9]  }
  0x7c   : > { %p3841_p4 = scmp.ne.s32.totalorder %s4190_s5, %s3840_s24  ;;  %s3845_s27 = sshll.u32 %s3954_s17, 4  ;;  %s3846_s27 = int_to_ptr.vmem [resolvable:$false] %s3845_s27 }
  0x7d   : > { %s3847_s14 = scalar_lea.vmem %s3846_s27, 8192  ;;  %p3848_p8 = scmp.lt.s32.totalorder %s4190_s5, %s3846_s27 }
  0x7e   : > { %p3843_p7 = pnand %p3841_p4, %p4648_p2  ;;  %p3849_p12 = scmp.lt.s32.totalorder %s3847_s14, %s3840_s24 }
  0x80   : > { %p3844_p6 = pneg %p3843_p7  ;;  %p3850_p0 = por %p3849_p12, %p3848_p8 }
  0x82   : > { %p3851_p3 = pnand %p3850_p0, %p3844_p6 }
  0x84   : > { %3854 = shalt.err (!%p3851_p3)
}
  0x85   : > { %s3955_s28 = smov 64   ;;  %s3956_s11 = smov 4  }
  0x86   : > { %3255 = dma.hbm_to_vmem [thread:$0]  (!%p4649_p9), %s4186_s30, 4096, %s4190_s5, %s238_s29, %s3955_s28, %s3955_s28, %s3956_s11  }
  0x87   : > { %p4650_p2 = scmp.ne.s32.totalorder %s4645_s23, 0 }
  0x88   : > { %p4651_p11 = scmp.eq.s32.totalorder (!%p4650_p2), %s4087_s13, 0 }
  0x89   : > { %260 = sbr.rel (%p4650_p2) target bundleno = 865 (0x361), region = 36 }
  0x90   : > { %3908 = dma.done.wait (%p4651_p11), [#allocation4], 1024   ;;  %p4652_p1 = pmov %p4651_p11 }
  0x91   : > { %s266_s12 = sand.u32 1, %s4087_s13   ;;  %s4224_s25 = sand.u32 1, %s3929_s16  }
  0x92   : > { %3910 = vsyncadd (%p4652_p1), [#allocation4], 4294966272  ;;  %s2853_s1 = sshll.u32 %s4224_s25, 11  ;;  %s267_s9 = scalar_lea.sflag [#allocation7], %s266_s12 }
  0x93   : > { %s4227_s26 = scalar_lea.vmem [#allocation6], %s2853_s1  ;;  %p4653_p9 = scmp.ne.s32.totalorder %s4641_s22, 0 }
  0x95   : > { %3912 = dma.done.wait (%p4653_p9), %s267_s9, 32832  }
  0x96   : > { %3914 = vsyncadd (%p4653_p9), %s267_s9, 4294934464  ;;  %s2854_s23 = sshll.u32 %s4224_s25, 2  ;;  %s2855_s30 = sshll.u32 %s4224_s25, 8 }
  0x97   : > { %s4235_s5 = scalar_lea.vmem [#allocation8], %s2854_s23  ;;  %s285_s13 = scalar_lea.sflag [#allocation10], %s4224_s25 }
  0x98   : > { %s4238_s29 = scalar_lea.vmem [#allocation9], %s2855_s30 }
  0x99   : > { %3916 = dma.done.wait (%p4653_p9), %s285_s13, 4096  }
  0x9a   : > { %3918 = vsyncadd (%p4653_p9), %s285_s13, 4294963200  ;;  %v3321_v0 = vld [vmem:[%s4227_s26 + $0x4] ss:$16 sps:$4 sm:$0xff]   ;;  %v3323_v1 = vld [vmem:[%s4227_s26 + $0xc] ss:$16 sps:$4 sm:$0xff]   ;;  %s2856_s22 = sshll.u32 %s4224_s25, 4 }
  0x9b   : > { %1937 = vmatprep.subr.bf16.mxu0 %v3321_v0  ;;  %v3325_v2 = vld [vmem:[%s4227_s26] ss:$16 sps:$4 sm:$0xff]   ;;  %v3326_v3 = vld [vmem:[%s4227_s26 + $0x8] ss:$16 sps:$4 sm:$0xff]   ;;  %2109 = vmatprep.subr.bf16.mxu1 %v3323_v1  ;;  %v3327_v4 = vld [vmem:[%s4227_s26 + $0x24] ss:$16 sps:$4 sm:$0xff]  }
  0x9c   : > { %1938 = vmatpush1.bf16.msra.mxu0 %v3325_v2  ;;  %2110 = vmatpush1.bf16.msra.mxu1 %v3326_v3  ;;  %v3329_v5 = vld [vmem:[%s4227_s26 + $0x2c] ss:$16 sps:$4 sm:$0xff]   ;;  %v3331_v6 = vld [vmem:[%s4227_s26 + $0x20] ss:$16 sps:$4 sm:$0xff]   ;;  %v3332_v7 = vld [vmem:[%s4227_s26 + $0x28] ss:$16 sps:$4 sm:$0xff]  }
  0x9d   : > { %1939 = vmatprep.subr.bf16.mxu0 %v3327_v4  ;;  %2111 = vmatprep.subr.bf16.mxu1 %v3329_v5  ;;  %v3333_v8 = vld [vmem:[%s4227_s26 + $0x44] ss:$16 sps:$4 sm:$0xff]   ;;  %v3335_v9 = vld [vmem:[%s4227_s26 + $0x4c] ss:$16 sps:$4 sm:$0xff]   ;;  %v3337_v10 = vld [vmem:[%s4227_s26 + $0x40] ss:$16 sps:$4 sm:$0xff]  }
  0x9e   : > { %v3338_v11 = vld [vmem:[%s4227_s26 + $0x48] ss:$16 sps:$4 sm:$0xff]   ;;  %v3339_v12 = vld [vmem:[%s4227_s26 + $0x64] ss:$16 sps:$4 sm:$0xff]   ;;  %v3341_v13 = vld [vmem:[%s4227_s26 + $0x6c] ss:$16 sps:$4 sm:$0xff]  }
  0x9f   : > { %v3343_v14 = vld [vmem:[%s4227_s26 + $0x60] ss:$16 sps:$4 sm:$0xff]   ;;  %v3344_v15 = vld [vmem:[%s4227_s26 + $0x68] ss:$16 sps:$4 sm:$0xff]   ;;  %v3345_v16 = vld [vmem:[%s4227_s26 + $0x84] ss:$16 sps:$4 sm:$0xff]  }
  0xa0   : > { %1940 = vmatpush1.bf16.msra.mxu0 %v3331_v6  ;;  %2112 = vmatpush1.bf16.msra.mxu1 %v3332_v7  ;;  %v3347_v17 = vld [vmem:[%s4227_s26 + $0x8c] ss:$16 sps:$4 sm:$0xff]   ;;  %v3349_v18 = vld [vmem:[%s4227_s26 + $0x80] ss:$16 sps:$4 sm:$0xff]   ;;  %v3350_v19 = vld [vmem:[%s4227_s26 + $0x88] ss:$16 sps:$4 sm:$0xff]  }
  0xa1   : > { %1941 = vmatprep.subr.bf16.mxu0 %v3333_v8  ;;  %2113 = vmatprep.subr.bf16.mxu1 %v3335_v9  ;;  %v3351_v20 = vld [vmem:[%s4227_s26 + $0xa4] ss:$16 sps:$4 sm:$0xff]   ;;  %v3353_v21 = vld [vmem:[%s4227_s26 + $0xac] ss:$16 sps:$4 sm:$0xff]   ;;  %v3355_v22 = vld [vmem:[%s4227_s26 + $0xa0] ss:$16 sps:$4 sm:$0xff]  }
  0xa2   : > { %v3356_v23 = vld [vmem:[%s4227_s26 + $0xa8] ss:$16 sps:$4 sm:$0xff]   ;;  %v3357_v24 = vld [vmem:[%s4227_s26 + $0xc4] ss:$16 sps:$4 sm:$0xff]   ;;  %v3359_v25 = vld [vmem:[%s4227_s26 + $0xcc] ss:$16 sps:$4 sm:$0xff]  }
  0xa3   : > { %v3361_v26 = vld [vmem:[%s4227_s26 + $0xc0] ss:$16 sps:$4 sm:$0xff]   ;;  %v3362_v27 = vld [vmem:[%s4227_s26 + $0xc8] ss:$16 sps:$4 sm:$0xff]   ;;  %v3363_v28 = vld [vmem:[%s4227_s26 + $0xe4] ss:$16 sps:$4 sm:$0xff]  }
  0xa4   : > { %1942 = vmatpush1.bf16.msra.mxu0 %v3337_v10  ;;  %2114 = vmatpush1.bf16.msra.mxu1 %v3338_v11  ;;  %v3365_v29 = vld [vmem:[%s4227_s26 + $0xec] ss:$16 sps:$4 sm:$0xff]   ;;  %v3367_v30 = vld [vmem:[%s4227_s26 + $0xe0] ss:$16 sps:$4 sm:$0xff]   ;;  %v3368_v31 = vld [vmem:[%s4227_s26 + $0xe8] ss:$16 sps:$4 sm:$0xff]  }
  0xa5   : > { %1943 = vmatprep.subr.bf16.mxu0 %v3339_v12  ;;  %2115 = vmatprep.subr.bf16.mxu1 %v3341_v13  ;;  %v3369_v32 = vld [vmem:[%s4227_s26 + $0x104] ss:$16 sps:$4 sm:$0xff]   ;;  %v3371_v33 = vld [vmem:[%s4227_s26 + $0x10c] ss:$16 sps:$4 sm:$0xff]   ;;  %v3373_v34 = vld [vmem:[%s4227_s26 + $0x100] ss:$16 sps:$4 sm:$0xff]  }
  0xa6   : > { %v3374_v35 = vld [vmem:[%s4227_s26 + $0x108] ss:$16 sps:$4 sm:$0xff]   ;;  %v3375_v36 = vld [vmem:[%s4227_s26 + $0x124] ss:$16 sps:$4 sm:$0xff]   ;;  %v3377_v37 = vld [vmem:[%s4227_s26 + $0x12c] ss:$16 sps:$4 sm:$0xff]  }
  0xa7   : > { %v3379_v38 = vld [vmem:[%s4227_s26 + $0x120] ss:$16 sps:$4 sm:$0xff]   ;;  %v3380_v39 = vld [vmem:[%s4227_s26 + $0x128] ss:$16 sps:$4 sm:$0xff]   ;;  %v3381_v40 = vld [vmem:[%s4227_s26 + $0x144] ss:$16 sps:$4 sm:$0xff]  }
  0xa8   : > { %1944 = vmatpush1.bf16.msra.mxu0 %v3343_v14  ;;  %2116 = vmatpush1.bf16.msra.mxu1 %v3344_v15  ;;  %v3383_v41 = vld [vmem:[%s4227_s26 + $0x14c] ss:$16 sps:$4 sm:$0xff]   ;;  %v3385_v42 = vld [vmem:[%s4227_s26 + $0x140] ss:$16 sps:$4 sm:$0xff]   ;;  %v3386_v43 = vld [vmem:[%s4227_s26 + $0x148] ss:$16 sps:$4 sm:$0xff]  }
  0xa9   : > { %1945 = vmatprep.subr.bf16.mxu0 %v3345_v16  ;;  %2117 = vmatprep.subr.bf16.mxu1 %v3347_v17  ;;  %v3387_v44 = vld [vmem:[%s4227_s26 + $0x164] ss:$16 sps:$4 sm:$0xff]   ;;  %v3389_v45 = vld [vmem:[%s4227_s26 + $0x16c] ss:$16 sps:$4 sm:$0xff]   ;;  %v3391_v48 = vld [vmem:[%s4227_s26 + $0x160] ss:$16 sps:$4 sm:$0xff]  }
  0xaa   : > { %v345_v46 = vld [vmem:[#allocation3] sm:$0xff]  ;;  %v3392_v49 = vld [vmem:[%s4227_s26 + $0x168] ss:$16 sps:$4 sm:$0xff]   ;;  %v3395_v52 = vld [vmem:[%s4227_s26 + $0x18c] ss:$16 sps:$4 sm:$0xff]   ;;  %s322_s10 = scalar_lea.vmem [#allocation11], %s2856_s22 }
  0xab   : > { %v349_v47 = vld [vmem:[#allocation3 + $0x20] sm:$0xff]  ;;  %v3398_v54 = vld [vmem:[%s4227_s26 + $0x188] ss:$16 sps:$4 sm:$0xff]   ;;  %v3401_v56 = vld [vmem:[%s4227_s26 + $0x1ac] ss:$16 sps:$4 sm:$0xff]   ;;  %s2696_s7 = sshll.u32 %s322_s10, 4  ;;  %s4559_s7 = int_to_ptr.vmem [resolvable:$true] %s2696_s7 }
  0xac   : > { %1946 = vmatpush1.bf16.msra.mxu0 %v3349_v18  ;;  %2118 = vmatpush1.bf16.msra.mxu1 %v3350_v19  ;;  %v2858_v50 = vcombine.high %v345_v46, %v349_v47  ;;  %v3393_v51 = vld [vmem:[%s4227_s26 + $0x184] ss:$16 sps:$4 sm:$0xff]   ;;  %v3397_v53 = vld [vmem:[%s4227_s26 + $0x180] ss:$16 sps:$4 sm:$0xff]   ;;  %v3404_v58 = vld [vmem:[%s4227_s26 + $0x1a8] ss:$16 sps:$4 sm:$0xff]   ;;  %v2857_v5 = vcombine.low %v345_v46, %v349_v47 }
  0xad   : > { %1947 = vmatprep.subr.bf16.mxu0 %v3351_v20  ;;  %2119 = vmatprep.subr.bf16.mxu1 %v3353_v21  ;;  %v3399_v55 = vld [vmem:[%s4227_s26 + $0x1a4] ss:$16 sps:$4 sm:$0xff]   ;;  %v3403_v57 = vld [vmem:[%s4227_s26 + $0x1a0] ss:$16 sps:$4 sm:$0xff]   ;;  %v3407_v60 = vld [vmem:[%s4227_s26 + $0x1cc] ss:$16 sps:$4 sm:$0xff]  }
  0xae   : > { %1969 = vmatprep.mubr.bf16.mxu0 %v2858_v50  ;;  %2141 = vmatprep.mubr.bf16.mxu1 %v2858_v50  ;;  %v3405_v59 = vld [vmem:[%s4227_s26 + $0x1c4] ss:$16 sps:$4 sm:$0xff]   ;;  %v3409_v61 = vld [vmem:[%s4227_s26 + $0x1c0] ss:$16 sps:$4 sm:$0xff]   ;;  %v3410_v62 = vld [vmem:[%s4227_s26 + $0x1c8] ss:$16 sps:$4 sm:$0xff]  }
  0xaf   : > { %v3411_v63 = vld [vmem:[%s4227_s26 + $0x1e4] ss:$16 sps:$4 sm:$0xff]   ;;  %v3413_v0 = vld [vmem:[%s4227_s26 + $0x1ec] ss:$16 sps:$4 sm:$0xff]   ;;  %v3415_v1 = vld [vmem:[%s4227_s26 + $0x1e0] ss:$16 sps:$4 sm:$0xff]  }
  0xb0   : > { %1948 = vmatpush1.bf16.msra.mxu0 %v3355_v22  ;;  %2120 = vmatpush1.bf16.msra.mxu1 %v3356_v23  ;;  %v3416_v2 = vld [vmem:[%s4227_s26 + $0x1e8] ss:$16 sps:$4 sm:$0xff]   ;;  %v3419_v3 = vld [vmem:[%s4227_s26 + $0x204] ss:$16 sps:$4 sm:$0xff]   ;;  %v3422_v4 = vld [vmem:[%s4227_s26 + $0x20c] ss:$16 sps:$4 sm:$0xff]  }
  0xb1   : > { %1949 = vmatprep.subr.bf16.mxu0 %v3357_v24  ;;  %2121 = vmatprep.subr.bf16.mxu1 %v3359_v25  ;;  %v3417_v6 = vld [vmem:[%s4227_s26 + $0x200] ss:$16 sps:$4 sm:$0xff]   ;;  %v3420_v7 = vld [vmem:[%s4227_s26 + $0x208] ss:$16 sps:$4 sm:$0xff]   ;;  %v3425_v8 = vld [vmem:[%s4227_s26 + $0x224] ss:$16 sps:$4 sm:$0xff]  }
  0xb2   : > { %v3428_v9 = vld [vmem:[%s4227_s26 + $0x22c] ss:$16 sps:$4 sm:$0xff]   ;;  %v3423_v10 = vld [vmem:[%s4227_s26 + $0x220] ss:$16 sps:$4 sm:$0xff]   ;;  %v3426_v11 = vld [vmem:[%s4227_s26 + $0x228] ss:$16 sps:$4 sm:$0xff]  }
  0xb3   : > { %v3431_v12 = vld [vmem:[%s4227_s26 + $0x244] ss:$16 sps:$4 sm:$0xff]   ;;  %v3434_v13 = vld [vmem:[%s4227_s26 + $0x24c] ss:$16 sps:$4 sm:$0xff]   ;;  %v3429_v14 = vld [vmem:[%s4227_s26 + $0x240] ss:$16 sps:$4 sm:$0xff]  }
  0xb4   : > { %1950 = vmatpush1.bf16.msra.mxu0 %v3361_v26  ;;  %2122 = vmatpush1.bf16.msra.mxu1 %v3362_v27  ;;  %v3432_v15 = vld [vmem:[%s4227_s26 + $0x248] ss:$16 sps:$4 sm:$0xff]   ;;  %v3437_v16 = vld [vmem:[%s4227_s26 + $0x264] ss:$16 sps:$4 sm:$0xff]   ;;  %v3440_v17 = vld [vmem:[%s4227_s26 + $0x26c] ss:$16 sps:$4 sm:$0xff]  }
  0xb5   : > { %1951 = vmatprep.subr.bf16.mxu0 %v3363_v28  ;;  %2123 = vmatprep.subr.bf16.mxu1 %v3365_v29  ;;  %v3435_v18 = vld [vmem:[%s4227_s26 + $0x260] ss:$16 sps:$4 sm:$0xff]   ;;  %v3438_v19 = vld [vmem:[%s4227_s26 + $0x268] ss:$16 sps:$4 sm:$0xff]   ;;  %v3443_v20 = vld [vmem:[%s4227_s26 + $0x284] ss:$16 sps:$4 sm:$0xff]  }
  0xb6   : > { %v3446_v21 = vld [vmem:[%s4227_s26 + $0x28c] ss:$16 sps:$4 sm:$0xff]   ;;  %v3441_v22 = vld [vmem:[%s4227_s26 + $0x280] ss:$16 sps:$4 sm:$0xff]   ;;  %v3444_v23 = vld [vmem:[%s4227_s26 + $0x288] ss:$16 sps:$4 sm:$0xff]  }
  0xb7   : > { %v3449_v24 = vld [vmem:[%s4227_s26 + $0x2a4] ss:$16 sps:$4 sm:$0xff]   ;;  %v3452_v25 = vld [vmem:[%s4227_s26 + $0x2ac] ss:$16 sps:$4 sm:$0xff]   ;;  %v3447_v26 = vld [vmem:[%s4227_s26 + $0x2a0] ss:$16 sps:$4 sm:$0xff]  }
  0xb8   : > { %1952 = vmatpush1.bf16.msra.mxu0 %v3367_v30  ;;  %2124 = vmatpush1.bf16.msra.mxu1 %v3368_v31  ;;  %v3450_v27 = vld [vmem:[%s4227_s26 + $0x2a8] ss:$16 sps:$4 sm:$0xff]   ;;  %v3455_v28 = vld [vmem:[%s4227_s26 + $0x2c4] ss:$16 sps:$4 sm:$0xff]   ;;  %v3458_v29 = vld [vmem:[%s4227_s26 + $0x2cc] ss:$16 sps:$4 sm:$0xff]  }
  0xb9   : > { %1953 = vmatprep.subr.bf16.mxu0 %v3369_v32  ;;  %2125 = vmatprep.subr.bf16.mxu1 %v3371_v33  ;;  %v4334_v30 = vld [vmem:[#allocation3 + $0x8] sm:$0xff]  ;;  %v3453_v32 = vld [vmem:[%s4227_s26 + $0x2c0] ss:$16 sps:$4 sm:$0xff]   ;;  %v3479_v47 = vld [vmem:[%s4227_s26 + $0x344] ss:$16 sps:$4 sm:$0xff]   ;;  %s3161_s21 = sshll.u32 %s3937_s18, 8 }
  0xba   : > { %v4336_v31 = vld [vmem:[#allocation3 + $0x28] sm:$0xff]  ;;  %s4564_s17 = scalar_lea.hbm %s4617_s4, %s3161_s21  ;;  %s2683_s27 = scalar_lea.sflag [#allocation5], %s4224_s25 }
  0xbb   : > { %v3456_v33 = vld [vmem:[%s4227_s26 + $0x2c8] ss:$16 sps:$4 sm:$0xff]   ;;  %s3855_s18 = scalar_lea.vmem %s4559_s7, 256  ;;  %p4654_p10 = scmp.ne.s32.totalorder %s4643_s6, 0 }
  0xbc   : > { %1954 = vmatpush1.bf16.msra.mxu0 %v3373_v34  ;;  %2126 = vmatpush1.bf16.msra.mxu1 %v3374_v35  ;;  %v2860_v34 = vcombine.high %v4334_v30, %v4336_v31  ;;  %v3461_v35 = vld [vmem:[%s4227_s26 + $0x2e4] ss:$16 sps:$4 sm:$0xff]   ;;  %v3474_v46 = vld [vmem:[%s4227_s26 + $0x328] ss:$16 sps:$4 sm:$0xff]   ;;  %p3856_p5 = scmp.ne.s32.totalorder %s4559_s7, %s3855_s18  ;;  %s3957_s14 = smov [#allocation11]  }
  0xbd   : > { %1955 = vmatprep.subr.bf16.mxu0 %v3375_v36  ;;  %2127 = vmatprep.subr.bf16.mxu1 %v3377_v37  ;;  %v3464_v36 = vld [vmem:[%s4227_s26 + $0x2ec] ss:$16 sps:$4 sm:$0xff]   ;;  %v3459_v37 = vld [vmem:[%s4227_s26 + $0x2e0] ss:$16 sps:$4 sm:$0xff]   ;;  %v3480_v50 = vld [vmem:[%s4227_s26 + $0x348] ss:$16 sps:$4 sm:$0xff]  }
  0xbe   : > { %p3857_p13 = pnand %p3856_p5, %p4654_p10  ;;  %s3859_s28 = sshll.u32 %s3957_s14, 4  ;;  %s3860_s28 = int_to_ptr.vmem [resolvable:$false] %s3859_s28 }
  0xbf   : > { %s3861_s11 = scalar_lea.vmem %s3860_s28, 512  ;;  %p3862_p7 = scmp.lt.s32.totalorder %s4559_s7, %s3860_s28 }
  0xc0   : > { %1956 = vmatpush1.bf16.msra.mxu0 %v3379_v38  ;;  %2128 = vmatpush1.bf16.msra.mxu1 %v3380_v39  ;;  %v3462_v38 = vld [vmem:[%s4227_s26 + $0x2e8] ss:$16 sps:$4 sm:$0xff]   ;;  %v3467_v39 = vld [vmem:[%s4227_s26 + $0x304] ss:$16 sps:$4 sm:$0xff]   ;;  %p3858_p4 = pneg %p3857_p13  ;;  %p3863_p6 = scmp.lt.s32.totalorder %s3861_s11, %s3855_s18 }
  0xc1   : > { %1957 = vmatprep.subr.bf16.mxu0 %v3381_v40  ;;  %2129 = vmatprep.subr.bf16.mxu1 %v3383_v41  ;;  %v3470_v40 = vld [vmem:[%s4227_s26 + $0x30c] ss:$16 sps:$4 sm:$0xff]   ;;  %v3465_v41 = vld [vmem:[%s4227_s26 + $0x300] ss:$16 sps:$4 sm:$0xff]  }
  0xc2   : > { %p3864_p8 = por %p3863_p6, %p3862_p7 }
  0xc4   : > { %1958 = vmatpush1.bf16.msra.mxu0 %v3385_v42  ;;  %2130 = vmatpush1.bf16.msra.mxu1 %v3386_v43  ;;  %v3468_v42 = vld [vmem:[%s4227_s26 + $0x308] ss:$16 sps:$4 sm:$0xff]   ;;  %v3473_v43 = vld [vmem:[%s4227_s26 + $0x324] ss:$16 sps:$4 sm:$0xff]   ;;  %p3865_p12 = pnand %p3864_p8, %p3858_p4 }
  0xc5   : > { %1959 = vmatprep.subr.bf16.mxu0 %v3387_v44  ;;  %2131 = vmatprep.subr.bf16.mxu1 %v3389_v45  ;;  %v3476_v44 = vld [vmem:[%s4227_s26 + $0x32c] ss:$16 sps:$4 sm:$0xff]   ;;  %v3471_v45 = vld [vmem:[%s4227_s26 + $0x320] ss:$16 sps:$4 sm:$0xff]  }
  0xc8   : > { %1960 = vmatpush1.bf16.msra.mxu0 %v3391_v48  ;;  %2132 = vmatpush1.bf16.msra.mxu1 %v3392_v49  ;;  %v3482_v48 = vld [vmem:[%s4227_s26 + $0x34c] ss:$16 sps:$4 sm:$0xff]   ;;  %v3477_v49 = vld [vmem:[%s4227_s26 + $0x340] ss:$16 sps:$4 sm:$0xff]  }
  0xc9   : > { %1961 = vmatprep.subr.bf16.mxu0 %v3393_v51  ;;  %2133 = vmatprep.subr.bf16.mxu1 %v3395_v52  ;;  %v3485_v51 = vld [vmem:[%s4227_s26 + $0x364] ss:$16 sps:$4 sm:$0xff]   ;;  %v3488_v52 = vld [vmem:[%s4227_s26 + $0x36c] ss:$16 sps:$4 sm:$0xff]  }
  0xcc   : > { %1962 = vmatpush1.bf16.msra.mxu0 %v3397_v53  ;;  %2134 = vmatpush1.bf16.msra.mxu1 %v3398_v54  ;;  %v3483_v53 = vld [vmem:[%s4227_s26 + $0x360] ss:$16 sps:$4 sm:$0xff]   ;;  %v3486_v54 = vld [vmem:[%s4227_s26 + $0x368] ss:$16 sps:$4 sm:$0xff]  }
  0xcd   : > { %1963 = vmatprep.subr.bf16.mxu0 %v3399_v55  ;;  %2135 = vmatprep.subr.bf16.mxu1 %v3401_v56  ;;  %v3491_v55 = vld [vmem:[%s4227_s26 + $0x384] ss:$16 sps:$4 sm:$0xff]   ;;  %v3494_v56 = vld [vmem:[%s4227_s26 + $0x38c] ss:$16 sps:$4 sm:$0xff]  }
  0xd0   : > { %1964 = vmatpush1.bf16.msra.mxu0 %v3403_v57  ;;  %2136 = vmatpush1.bf16.msra.mxu1 %v3404_v58  ;;  %v3489_v57 = vld [vmem:[%s4227_s26 + $0x380] ss:$16 sps:$4 sm:$0xff]   ;;  %v3492_v58 = vld [vmem:[%s4227_s26 + $0x388] ss:$16 sps:$4 sm:$0xff]  }
  0xd1   : > { %1965 = vmatprep.subr.bf16.mxu0 %v3405_v59  ;;  %2137 = vmatprep.subr.bf16.mxu1 %v3407_v60  ;;  %v3497_v59 = vld [vmem:[%s4227_s26 + $0x3a4] ss:$16 sps:$4 sm:$0xff]   ;;  %v3500_v60 = vld [vmem:[%s4227_s26 + $0x3ac] ss:$16 sps:$4 sm:$0xff]  }
  0xd4   : > { %1966 = vmatpush1.bf16.msra.mxu0 %v3409_v61  ;;  %2138 = vmatpush1.bf16.msra.mxu1 %v3410_v62  ;;  %v3495_v61 = vld [vmem:[%s4227_s26 + $0x3a0] ss:$16 sps:$4 sm:$0xff]   ;;  %v3498_v62 = vld [vmem:[%s4227_s26 + $0x3a8] ss:$16 sps:$4 sm:$0xff]  }
  0xd5   : > { %1967 = vmatprep.subr.bf16.mxu0 %v3411_v63  ;;  %2139 = vmatprep.subr.bf16.mxu1 %v3413_v0  ;;  %v3503_v63 = vld [vmem:[%s4227_s26 + $0x3c4] ss:$16 sps:$4 sm:$0xff]   ;;  %v3506_v0 = vld [vmem:[%s4227_s26 + $0x3cc] ss:$16 sps:$4 sm:$0xff]  }
  0xd8   : > { %1968 = vmatpush1.bf16.msra.mxu0 %v3415_v1  ;;  %2140 = vmatpush1.bf16.msra.mxu1 %v3416_v2  ;;  %v3501_v1 = vld [vmem:[%s4227_s26 + $0x3c0] ss:$16 sps:$4 sm:$0xff]   ;;  %v3504_v2 = vld [vmem:[%s4227_s26 + $0x3c8] ss:$16 sps:$4 sm:$0xff]  }
  0xd9   : > { %1980 = vmatprep.subr.bf16.mxu0 %v3419_v3  ;;  %2152 = vmatprep.subr.bf16.mxu1 %v3422_v4  ;;  %v3509_v3 = vld [vmem:[%s4227_s26 + $0x3e4] ss:$16 sps:$4 sm:$0xff]   ;;  %v3512_v4 = vld [vmem:[%s4227_s26 + $0x3ec] ss:$16 sps:$4 sm:$0xff]  }
  0xdb   : > { %1970 = vmatmul.mubr.bf16.vlgmr.msra.gmra.mrb[0].mxu0 %v2857_v5  ;;  %2142 = vmatmul.mubr.bf16.vlgmr.msra.gmra.mrb[0].mxu1 %v2857_v5  ;;  %v3507_v5 = vld [vmem:[%s4227_s26 + $0x3e0] ss:$16 sps:$4 sm:$0xff]  }
  0xdc   : > { %1981 = vmatpush1.bf16.msra.mxu0 %v3417_v6  ;;  %2153 = vmatpush1.bf16.msra.mxu1 %v3420_v7  ;;  %v3510_v6 = vld [vmem:[%s4227_s26 + $0x3e8] ss:$16 sps:$4 sm:$0xff]   ;;  %v3515_v7 = vld [vmem:[%s4227_s26 + $0x404] ss:$16 sps:$4 sm:$0xff]  }
  0xdd   : > { %1982 = vmatprep.subr.bf16.mxu0 %v3425_v8  ;;  %2154 = vmatprep.subr.bf16.mxu1 %v3428_v9  ;;  %v3518_v8 = vld [vmem:[%s4227_s26 + $0x40c] ss:$16 sps:$4 sm:$0xff]   ;;  %v2859_v9 = vcombine.low %v4334_v30, %v4336_v31  ;;  %v3540_v30 = vld [vmem:[%s4227_s26 + $0x488] ss:$16 sps:$4 sm:$0xff]   ;;  %v3545_v31 = vld [vmem:[%s4227_s26 + $0x4a4] ss:$16 sps:$4 sm:$0xff]  }
  0xde   : > { %2012 = vmatprep.mubr.bf16.mxu0 %v2860_v34  ;;  %2184 = vmatprep.mubr.bf16.mxu1 %v2860_v34  ;;  %v3546_v34 = vld [vmem:[%s4227_s26 + $0x4a8] ss:$16 sps:$4 sm:$0xff]  }
  0xe0   : > { %1983 = vmatpush1.bf16.msra.mxu0 %v3423_v10  ;;  %2155 = vmatpush1.bf16.msra.mxu1 %v3426_v11  ;;  %v3513_v10 = vld [vmem:[%s4227_s26 + $0x400] ss:$16 sps:$4 sm:$0xff]   ;;  %v3516_v11 = vld [vmem:[%s4227_s26 + $0x408] ss:$16 sps:$4 sm:$0xff]  }
  0xe1   : > { %1984 = vmatprep.subr.bf16.mxu0 %v3431_v12  ;;  %2156 = vmatprep.subr.bf16.mxu1 %v3434_v13  ;;  %v3521_v12 = vld [vmem:[%s4227_s26 + $0x424] ss:$16 sps:$4 sm:$0xff]   ;;  %v3524_v13 = vld [vmem:[%s4227_s26 + $0x42c] ss:$16 sps:$4 sm:$0xff]  }
  0xe4   : > { %1985 = vmatpush1.bf16.msra.mxu0 %v3429_v14  ;;  %2157 = vmatpush1.bf16.msra.mxu1 %v3432_v15  ;;  %v4386_v14 = vld [vmem:[#allocation3 + $0x10] sm:$0xff] }
  0xe5   : > { %1986 = vmatprep.subr.bf16.mxu0 %v3437_v16  ;;  %2158 = vmatprep.subr.bf16.mxu1 %v3440_v17  ;;  %v4388_v15 = vld [vmem:[#allocation3 + $0x30] sm:$0xff] }
  0xe6   : > { %v2862_v16 = vcombine.high %v4386_v14, %v4388_v15  ;;  %v3519_v17 = vld [vmem:[%s4227_s26 + $0x420] ss:$16 sps:$4 sm:$0xff]  }
  0xe8   : > { %1987 = vmatpush1.bf16.msra.mxu0 %v3435_v18  ;;  %2159 = vmatpush1.bf16.msra.mxu1 %v3438_v19  ;;  %v3522_v18 = vld [vmem:[%s4227_s26 + $0x428] ss:$16 sps:$4 sm:$0xff]   ;;  %v3527_v19 = vld [vmem:[%s4227_s26 + $0x444] ss:$16 sps:$4 sm:$0xff]  }
  0xe9   : > { %1988 = vmatprep.subr.bf16.mxu0 %v3443_v20  ;;  %2160 = vmatprep.subr.bf16.mxu1 %v3446_v21  ;;  %v3530_v20 = vld [vmem:[%s4227_s26 + $0x44c] ss:$16 sps:$4 sm:$0xff]   ;;  %v3525_v21 = vld [vmem:[%s4227_s26 + $0x440] ss:$16 sps:$4 sm:$0xff]  }
  0xec   : > { %1989 = vmatpush1.bf16.msra.mxu0 %v3441_v22  ;;  %2161 = vmatpush1.bf16.msra.mxu1 %v3444_v23  ;;  %v3528_v22 = vld [vmem:[%s4227_s26 + $0x448] ss:$16 sps:$4 sm:$0xff]   ;;  %v3533_v23 = vld [vmem:[%s4227_s26 + $0x464] ss:$16 sps:$4 sm:$0xff]  }
  0xed   : > { %1990 = vmatprep.subr.bf16.mxu0 %v3449_v24  ;;  %2162 = vmatprep.subr.bf16.mxu1 %v3452_v25  ;;  %v3536_v24 = vld [vmem:[%s4227_s26 + $0x46c] ss:$16 sps:$4 sm:$0xff]   ;;  %v3531_v25 = vld [vmem:[%s4227_s26 + $0x460] ss:$16 sps:$4 sm:$0xff]  }
  0xf0   : > { %1991 = vmatpush1.bf16.msra.mxu0 %v3447_v26  ;;  %2163 = vmatpush1.bf16.msra.mxu1 %v3450_v27  ;;  %v3534_v26 = vld [vmem:[%s4227_s26 + $0x468] ss:$16 sps:$4 sm:$0xff]   ;;  %v3539_v27 = vld [vmem:[%s4227_s26 + $0x484] ss:$16 sps:$4 sm:$0xff]  }
  0xf1   : > { %1992 = vmatprep.subr.bf16.mxu0 %v3455_v28  ;;  %2164 = vmatprep.subr.bf16.mxu1 %v3458_v29  ;;  %v3542_v28 = vld [vmem:[%s4227_s26 + $0x48c] ss:$16 sps:$4 sm:$0xff]   ;;  %v3537_v29 = vld [vmem:[%s4227_s26 + $0x480] ss:$16 sps:$4 sm:$0xff]  }
  0xf4   : > { %1993 = vmatpush1.bf16.msra.mxu0 %v3453_v32  ;;  %2165 = vmatpush1.bf16.msra.mxu1 %v3456_v33  ;;  %v3548_v32 = vld [vmem:[%s4227_s26 + $0x4ac] ss:$16 sps:$4 sm:$0xff]   ;;  %v3543_v33 = vld [vmem:[%s4227_s26 + $0x4a0] ss:$16 sps:$4 sm:$0xff]  }
  0xf5   : > { %1994 = vmatprep.subr.bf16.mxu0 %v3461_v35  ;;  %2166 = vmatprep.subr.bf16.mxu1 %v3464_v36  ;;  %v3551_v35 = vld [vmem:[%s4227_s26 + $0x4c4] ss:$16 sps:$4 sm:$0xff]   ;;  %v3554_v36 = vld [vmem:[%s4227_s26 + $0x4cc] ss:$16 sps:$4 sm:$0xff]  }
  0xf8   : > { %1995 = vmatpush1.bf16.msra.mxu0 %v3459_v37  ;;  %2167 = vmatpush1.bf16.msra.mxu1 %v3462_v38  ;;  %v3549_v37 = vld [vmem:[%s4227_s26 + $0x4c0] ss:$16 sps:$4 sm:$0xff]   ;;  %v3552_v38 = vld [vmem:[%s4227_s26 + $0x4c8] ss:$16 sps:$4 sm:$0xff]  }
  0xf9   : > { %1996 = vmatprep.subr.bf16.mxu0 %v3467_v39  ;;  %2168 = vmatprep.subr.bf16.mxu1 %v3470_v40  ;;  %v3557_v39 = vld [vmem:[%s4227_s26 + $0x4e4] ss:$16 sps:$4 sm:$0xff]   ;;  %v3560_v40 = vld [vmem:[%s4227_s26 + $0x4ec] ss:$16 sps:$4 sm:$0xff]  }
  0xfc   : > { %1997 = vmatpush1.bf16.msra.mxu0 %v3465_v41  ;;  %2169 = vmatpush1.bf16.msra.mxu1 %v3468_v42  ;;  %v3555_v41 = vld [vmem:[%s4227_s26 + $0x4e0] ss:$16 sps:$4 sm:$0xff]   ;;  %v3558_v42 = vld [vmem:[%s4227_s26 + $0x4e8] ss:$16 sps:$4 sm:$0xff]  }
  0xfd   : > { %1998 = vmatprep.subr.bf16.mxu0 %v3473_v43  ;;  %2170 = vmatprep.subr.bf16.mxu1 %v3476_v44  ;;  %v3563_v43 = vld [vmem:[%s4227_s26 + $0x504] ss:$16 sps:$4 sm:$0xff]   ;;  %v3566_v44 = vld [vmem:[%s4227_s26 + $0x50c] ss:$16 sps:$4 sm:$0xff]  }
 0x100   : > { %1999 = vmatpush1.bf16.msra.mxu0 %v3471_v45  ;;  %2171 = vmatpush1.bf16.msra.mxu1 %v3474_v46  ;;  %v3561_v45 = vld [vmem:[%s4227_s26 + $0x500] ss:$16 sps:$4 sm:$0xff]   ;;  %v3564_v46 = vld [vmem:[%s4227_s26 + $0x508] ss:$16 sps:$4 sm:$0xff]  }
 0x101   : > { %2000 = vmatprep.subr.bf16.mxu0 %v3479_v47  ;;  %2172 = vmatprep.subr.bf16.mxu1 %v3482_v48  ;;  %v3569_v47 = vld [vmem:[%s4227_s26 + $0x524] ss:$16 sps:$4 sm:$0xff]   ;;  %v3572_v48 = vld [vmem:[%s4227_s26 + $0x52c] ss:$16 sps:$4 sm:$0xff]  }
 0x104   : > { %2001 = vmatpush1.bf16.msra.mxu0 %v3477_v49  ;;  %2173 = vmatpush1.bf16.msra.mxu1 %v3480_v50  ;;  %v3567_v49 = vld [vmem:[%s4227_s26 + $0x520] ss:$16 sps:$4 sm:$0xff]   ;;  %v3570_v50 = vld [vmem:[%s4227_s26 + $0x528] ss:$16 sps:$4 sm:$0xff]  }
 0x105   : > { %2002 = vmatprep.subr.bf16.mxu0 %v3485_v51  ;;  %2174 = vmatprep.subr.bf16.mxu1 %v3488_v52  ;;  %v3575_v51 = vld [vmem:[%s4227_s26 + $0x544] ss:$16 sps:$4 sm:$0xff]   ;;  %v3578_v52 = vld [vmem:[%s4227_s26 + $0x54c] ss:$16 sps:$4 sm:$0xff]  }
 0x108   : > { %2003 = vmatpush1.bf16.msra.mxu0 %v3483_v53  ;;  %2175 = vmatpush1.bf16.msra.mxu1 %v3486_v54  ;;  %v3573_v53 = vld [vmem:[%s4227_s26 + $0x540] ss:$16 sps:$4 sm:$0xff]   ;;  %v3576_v54 = vld [vmem:[%s4227_s26 + $0x548] ss:$16 sps:$4 sm:$0xff]  }
 0x109   : > { %2004 = vmatprep.subr.bf16.mxu0 %v3491_v55  ;;  %2176 = vmatprep.subr.bf16.mxu1 %v3494_v56  ;;  %v3581_v55 = vld [vmem:[%s4227_s26 + $0x564] ss:$16 sps:$4 sm:$0xff]   ;;  %v3584_v56 = vld [vmem:[%s4227_s26 + $0x56c] ss:$16 sps:$4 sm:$0xff]  }
 0x10c   : > { %2005 = vmatpush1.bf16.msra.mxu0 %v3489_v57  ;;  %2177 = vmatpush1.bf16.msra.mxu1 %v3492_v58  ;;  %v3579_v57 = vld [vmem:[%s4227_s26 + $0x560] ss:$16 sps:$4 sm:$0xff]   ;;  %v3582_v58 = vld [vmem:[%s4227_s26 + $0x568] ss:$16 sps:$4 sm:$0xff]  }
 0x10d   : > { %2006 = vmatprep.subr.bf16.mxu0 %v3497_v59  ;;  %2178 = vmatprep.subr.bf16.mxu1 %v3500_v60  ;;  %v3587_v59 = vld [vmem:[%s4227_s26 + $0x584] ss:$16 sps:$4 sm:$0xff]   ;;  %v3590_v60 = vld [vmem:[%s4227_s26 + $0x58c] ss:$16 sps:$4 sm:$0xff]  }
 0x110   : > { %2007 = vmatpush1.bf16.msra.mxu0 %v3495_v61  ;;  %2179 = vmatpush1.bf16.msra.mxu1 %v3498_v62  ;;  %v3585_v61 = vld [vmem:[%s4227_s26 + $0x580] ss:$16 sps:$4 sm:$0xff]   ;;  %v3588_v62 = vld [vmem:[%s4227_s26 + $0x588] ss:$16 sps:$4 sm:$0xff]  }
 0x111   : > { %2008 = vmatprep.subr.bf16.mxu0 %v3503_v63  ;;  %2180 = vmatprep.subr.bf16.mxu1 %v3506_v0  ;;  %v3593_v63 = vld [vmem:[%s4227_s26 + $0x5a4] ss:$16 sps:$4 sm:$0xff]   ;;  %v3596_v0 = vld [vmem:[%s4227_s26 + $0x5ac] ss:$16 sps:$4 sm:$0xff]  }
 0x114   : > { %2009 = vmatpush1.bf16.msra.mxu0 %v3501_v1  ;;  %2181 = vmatpush1.bf16.msra.mxu1 %v3504_v2  ;;  %v3591_v1 = vld [vmem:[%s4227_s26 + $0x5a0] ss:$16 sps:$4 sm:$0xff]   ;;  %v3594_v2 = vld [vmem:[%s4227_s26 + $0x5a8] ss:$16 sps:$4 sm:$0xff]  }
 0x115   : > { %2010 = vmatprep.subr.bf16.mxu0 %v3509_v3  ;;  %2182 = vmatprep.subr.bf16.mxu1 %v3512_v4  ;;  %v3599_v3 = vld [vmem:[%s4227_s26 + $0x5c4] ss:$16 sps:$4 sm:$0xff]   ;;  %v3602_v4 = vld [vmem:[%s4227_s26 + $0x5cc] ss:$16 sps:$4 sm:$0xff]  }
 0x118   : > { %2011 = vmatpush1.bf16.msra.mxu0 %v3507_v5  ;;  %2183 = vmatpush1.bf16.msra.mxu1 %v3510_v6  ;;  %v3597_v5 = vld [vmem:[%s4227_s26 + $0x5c0] ss:$16 sps:$4 sm:$0xff]   ;;  %v3600_v6 = vld [vmem:[%s4227_s26 + $0x5c8] ss:$16 sps:$4 sm:$0xff]  }
 0x119   : > { %2023 = vmatprep.subr.bf16.mxu0 %v3515_v7  ;;  %2195 = vmatprep.subr.bf16.mxu1 %v3518_v8  ;;  %v3605_v7 = vld [vmem:[%s4227_s26 + $0x5e4] ss:$16 sps:$4 sm:$0xff]   ;;  %v3608_v8 = vld [vmem:[%s4227_s26 + $0x5ec] ss:$16 sps:$4 sm:$0xff]  }
 0x11b   : > { %2013 = vmatmul.mubr.bf16.vlgmr.msra.gmra.mrb[0].mxu0 %v2859_v9  ;;  %2185 = vmatmul.mubr.bf16.vlgmr.msra.gmra.mrb[0].mxu1 %v2859_v9  ;;  %v3603_v9 = vld [vmem:[%s4227_s26 + $0x5e0] ss:$16 sps:$4 sm:$0xff]  }
 0x11c   : > { %2024 = vmatpush1.bf16.msra.mxu0 %v3513_v10  ;;  %2196 = vmatpush1.bf16.msra.mxu1 %v3516_v11  ;;  %v3606_v10 = vld [vmem:[%s4227_s26 + $0x5e8] ss:$16 sps:$4 sm:$0xff]   ;;  %v3611_v11 = vld [vmem:[%s4227_s26 + $0x604] ss:$16 sps:$4 sm:$0xff]  }
 0x11d   : > { %2025 = vmatprep.subr.bf16.mxu0 %v3521_v12  ;;  %2197 = vmatprep.subr.bf16.mxu1 %v3524_v13  ;;  %v3614_v12 = vld [vmem:[%s4227_s26 + $0x60c] ss:$16 sps:$4 sm:$0xff]   ;;  %v3609_v13 = vld [vmem:[%s4227_s26 + $0x600] ss:$16 sps:$4 sm:$0xff]  }
 0x11e   : > { %2055 = vmatprep.mubr.bf16.mxu0 %v2862_v16  ;;  %2227 = vmatprep.mubr.bf16.mxu1 %v2862_v16  ;;  %v3612_v16 = vld [vmem:[%s4227_s26 + $0x608] ss:$16 sps:$4 sm:$0xff]  }
 0x120   : > { %2026 = vmatpush1.bf16.msra.mxu0 %v3519_v17  ;;  %2198 = vmatpush1.bf16.msra.mxu1 %v3522_v18  ;;  %v4454_v17 = vld [vmem:[#allocation3 + $0x18] sm:$0xff]  ;;  %v2861_v18 = vcombine.low %v4386_v14, %v4388_v15  ;;  %v3623_v15 = vld [vmem:[%s4227_s26 + $0x644] ss:$16 sps:$4 sm:$0xff]  }
 0x121   : > { %2027 = vmatprep.subr.bf16.mxu0 %v3527_v19  ;;  %2199 = vmatprep.subr.bf16.mxu1 %v3530_v20  ;;  %v4458_v19 = vld [vmem:[#allocation3 + $0x38] sm:$0xff]  ;;  %v3617_v20 = vld [vmem:[%s4227_s26 + $0x624] ss:$16 sps:$4 sm:$0xff]  }
 0x122   : > { %v3618_v14 = vld [vmem:[%s4227_s26 + $0x628] ss:$16 sps:$4 sm:$0xff]  }
 0x124   : > { %2028 = vmatpush1.bf16.msra.mxu0 %v3525_v21  ;;  %2200 = vmatpush1.bf16.msra.mxu1 %v3528_v22  ;;  %v3620_v21 = vld [vmem:[%s4227_s26 + $0x62c] ss:$16 sps:$4 sm:$0xff]   ;;  %v3615_v22 = vld [vmem:[%s4227_s26 + $0x620] ss:$16 sps:$4 sm:$0xff]  }
 0x125   : > { %2029 = vmatprep.subr.bf16.mxu0 %v3533_v23  ;;  %2201 = vmatprep.subr.bf16.mxu1 %v3536_v24  ;;  %v2864_v23 = vcombine.high %v4454_v17, %v4458_v19  ;;  %v3626_v24 = vld [vmem:[%s4227_s26 + $0x64c] ss:$16 sps:$4 sm:$0xff]  }
 0x128   : > { %2030 = vmatpush1.bf16.msra.mxu0 %v3531_v25  ;;  %2202 = vmatpush1.bf16.msra.mxu1 %v3534_v26  ;;  %v3621_v25 = vld [vmem:[%s4227_s26 + $0x640] ss:$16 sps:$4 sm:$0xff]   ;;  %v3624_v26 = vld [vmem:[%s4227_s26 + $0x648] ss:$16 sps:$4 sm:$0xff]  }
 0x129   : > { %2031 = vmatprep.subr.bf16.mxu0 %v3539_v27  ;;  %2203 = vmatprep.subr.bf16.mxu1 %v3542_v28  ;;  %v3629_v27 = vld [vmem:[%s4227_s26 + $0x664] ss:$16 sps:$4 sm:$0xff]   ;;  %v3632_v28 = vld [vmem:[%s4227_s26 + $0x66c] ss:$16 sps:$4 sm:$0xff]  }
 0x12c   : > { %2032 = vmatpush1.bf16.msra.mxu0 %v3537_v29  ;;  %2204 = vmatpush1.bf16.msra.mxu1 %v3540_v30  ;;  %v3627_v29 = vld [vmem:[%s4227_s26 + $0x660] ss:$16 sps:$4 sm:$0xff]   ;;  %v3630_v30 = vld [vmem:[%s4227_s26 + $0x668] ss:$16 sps:$4 sm:$0xff]  }
 0x12d   : > { %2033 = vmatprep.subr.bf16.mxu0 %v3545_v31  ;;  %2205 = vmatprep.subr.bf16.mxu1 %v3548_v32  ;;  %v3635_v31 = vld [vmem:[%s4227_s26 + $0x684] ss:$16 sps:$4 sm:$0xff]   ;;  %v3638_v32 = vld [vmem:[%s4227_s26 + $0x68c] ss:$16 sps:$4 sm:$0xff]  }
 0x130   : > { %2034 = vmatpush1.bf16.msra.mxu0 %v3543_v33  ;;  %2206 = vmatpush1.bf16.msra.mxu1 %v3546_v34  ;;  %v3633_v33 = vld [vmem:[%s4227_s26 + $0x680] ss:$16 sps:$4 sm:$0xff]   ;;  %v3636_v34 = vld [vmem:[%s4227_s26 + $0x688] ss:$16 sps:$4 sm:$0xff]  }
 0x131   : > { %2035 = vmatprep.subr.bf16.mxu0 %v3551_v35  ;;  %2207 = vmatprep.subr.bf16.mxu1 %v3554_v36  ;;  %v3641_v35 = vld [vmem:[%s4227_s26 + $0x6a4] ss:$16 sps:$4 sm:$0xff]   ;;  %v3644_v36 = vld [vmem:[%s4227_s26 + $0x6ac] ss:$16 sps:$4 sm:$0xff]  }
 0x134   : > { %2036 = vmatpush1.bf16.msra.mxu0 %v3549_v37  ;;  %2208 = vmatpush1.bf16.msra.mxu1 %v3552_v38  ;;  %v3639_v37 = vld [vmem:[%s4227_s26 + $0x6a0] ss:$16 sps:$4 sm:$0xff]   ;;  %v3642_v38 = vld [vmem:[%s4227_s26 + $0x6a8] ss:$16 sps:$4 sm:$0xff]  }
 0x135   : > { %2037 = vmatprep.subr.bf16.mxu0 %v3557_v39  ;;  %2209 = vmatprep.subr.bf16.mxu1 %v3560_v40  ;;  %v3647_v39 = vld [vmem:[%s4227_s26 + $0x6c4] ss:$16 sps:$4 sm:$0xff]   ;;  %v3650_v40 = vld [vmem:[%s4227_s26 + $0x6cc] ss:$16 sps:$4 sm:$0xff]  }
 0x138   : > { %2038 = vmatpush1.bf16.msra.mxu0 %v3555_v41  ;;  %2210 = vmatpush1.bf16.msra.mxu1 %v3558_v42  ;;  %v3645_v41 = vld [vmem:[%s4227_s26 + $0x6c0] ss:$16 sps:$4 sm:$0xff]   ;;  %v3648_v42 = vld [vmem:[%s4227_s26 + $0x6c8] ss:$16 sps:$4 sm:$0xff]  }
 0x139   : > { %2039 = vmatprep.subr.bf16.mxu0 %v3563_v43  ;;  %2211 = vmatprep.subr.bf16.mxu1 %v3566_v44  ;;  %v3653_v43 = vld [vmem:[%s4227_s26 + $0x6e4] ss:$16 sps:$4 sm:$0xff]   ;;  %v3656_v44 = vld [vmem:[%s4227_s26 + $0x6ec] ss:$16 sps:$4 sm:$0xff]  }
 0x13c   : > { %2040 = vmatpush1.bf16.msra.mxu0 %v3561_v45  ;;  %2212 = vmatpush1.bf16.msra.mxu1 %v3564_v46  ;;  %v3651_v45 = vld [vmem:[%s4227_s26 + $0x6e0] ss:$16 sps:$4 sm:$0xff]   ;;  %v3654_v46 = vld [vmem:[%s4227_s26 + $0x6e8] ss:$16 sps:$4 sm:$0xff]  }
 0x13d   : > { %2041 = vmatprep.subr.bf16.mxu0 %v3569_v47  ;;  %2213 = vmatprep.subr.bf16.mxu1 %v3572_v48  ;;  %v3659_v47 = vld [vmem:[%s4227_s26 + $0x704] ss:$16 sps:$4 sm:$0xff]   ;;  %v3662_v48 = vld [vmem:[%s4227_s26 + $0x70c] ss:$16 sps:$4 sm:$0xff]  }
 0x140   : > { %2042 = vmatpush1.bf16.msra.mxu0 %v3567_v49  ;;  %2214 = vmatpush1.bf16.msra.mxu1 %v3570_v50  ;;  %v3657_v49 = vld [vmem:[%s4227_s26 + $0x700] ss:$16 sps:$4 sm:$0xff]   ;;  %v3660_v50 = vld [vmem:[%s4227_s26 + $0x708] ss:$16 sps:$4 sm:$0xff]  }
 0x141   : > { %2043 = vmatprep.subr.bf16.mxu0 %v3575_v51  ;;  %2215 = vmatprep.subr.bf16.mxu1 %v3578_v52  ;;  %v3665_v51 = vld [vmem:[%s4227_s26 + $0x724] ss:$16 sps:$4 sm:$0xff]   ;;  %v3668_v52 = vld [vmem:[%s4227_s26 + $0x72c] ss:$16 sps:$4 sm:$0xff]  }
 0x144   : > { %2044 = vmatpush1.bf16.msra.mxu0 %v3573_v53  ;;  %2216 = vmatpush1.bf16.msra.mxu1 %v3576_v54  ;;  %v3663_v53 = vld [vmem:[%s4227_s26 + $0x720] ss:$16 sps:$4 sm:$0xff]   ;;  %v3666_v54 = vld [vmem:[%s4227_s26 + $0x728] ss:$16 sps:$4 sm:$0xff]  }
 0x145   : > { %2045 = vmatprep.subr.bf16.mxu0 %v3581_v55  ;;  %2217 = vmatprep.subr.bf16.mxu1 %v3584_v56  ;;  %v3671_v55 = vld [vmem:[%s4227_s26 + $0x744] ss:$16 sps:$4 sm:$0xff]   ;;  %v3674_v56 = vld [vmem:[%s4227_s26 + $0x74c] ss:$16 sps:$4 sm:$0xff]  }
 0x148   : > { %2046 = vmatpush1.bf16.msra.mxu0 %v3579_v57  ;;  %2218 = vmatpush1.bf16.msra.mxu1 %v3582_v58  ;;  %v3669_v57 = vld [vmem:[%s4227_s26 + $0x740] ss:$16 sps:$4 sm:$0xff]   ;;  %v3672_v58 = vld [vmem:[%s4227_s26 + $0x748] ss:$16 sps:$4 sm:$0xff]  }
 0x149   : > { %2047 = vmatprep.subr.bf16.mxu0 %v3587_v59  ;;  %2219 = vmatprep.subr.bf16.mxu1 %v3590_v60  ;;  %v3677_v59 = vld [vmem:[%s4227_s26 + $0x764] ss:$16 sps:$4 sm:$0xff]   ;;  %v3680_v60 = vld [vmem:[%s4227_s26 + $0x76c] ss:$16 sps:$4 sm:$0xff]  }
 0x14c   : > { %2048 = vmatpush1.bf16.msra.mxu0 %v3585_v61  ;;  %2220 = vmatpush1.bf16.msra.mxu1 %v3588_v62  ;;  %v3675_v61 = vld [vmem:[%s4227_s26 + $0x760] ss:$16 sps:$4 sm:$0xff]   ;;  %v3678_v62 = vld [vmem:[%s4227_s26 + $0x768] ss:$16 sps:$4 sm:$0xff]  }
 0x14d   : > { %2049 = vmatprep.subr.bf16.mxu0 %v3593_v63  ;;  %2221 = vmatprep.subr.bf16.mxu1 %v3596_v0  ;;  %v3683_v63 = vld [vmem:[%s4227_s26 + $0x784] ss:$16 sps:$4 sm:$0xff]   ;;  %v3686_v0 = vld [vmem:[%s4227_s26 + $0x78c] ss:$16 sps:$4 sm:$0xff]  }
 0x150   : > { %2050 = vmatpush1.bf16.msra.mxu0 %v3591_v1  ;;  %2222 = vmatpush1.bf16.msra.mxu1 %v3594_v2  ;;  %v3681_v1 = vld [vmem:[%s4227_s26 + $0x780] ss:$16 sps:$4 sm:$0xff]   ;;  %v3684_v2 = vld [vmem:[%s4227_s26 + $0x788] ss:$16 sps:$4 sm:$0xff]  }
 0x151   : > { %2051 = vmatprep.subr.bf16.mxu0 %v3599_v3  ;;  %2223 = vmatprep.subr.bf16.mxu1 %v3602_v4  ;;  %v3689_v3 = vld [vmem:[%s4227_s26 + $0x7a4] ss:$16 sps:$4 sm:$0xff]   ;;  %v3692_v4 = vld [vmem:[%s4227_s26 + $0x7ac] ss:$16 sps:$4 sm:$0xff]  }
 0x154   : > { %2052 = vmatpush1.bf16.msra.mxu0 %v3597_v5  ;;  %2224 = vmatpush1.bf16.msra.mxu1 %v3600_v6  ;;  %v3687_v5 = vld [vmem:[%s4227_s26 + $0x7a0] ss:$16 sps:$4 sm:$0xff]   ;;  %v3690_v6 = vld [vmem:[%s4227_s26 + $0x7a8] ss:$16 sps:$4 sm:$0xff]  }
 0x155   : > { %2053 = vmatprep.subr.bf16.mxu0 %v3605_v7  ;;  %2225 = vmatprep.subr.bf16.mxu1 %v3608_v8  ;;  %v3695_v7 = vld [vmem:[%s4227_s26 + $0x7c4] ss:$16 sps:$4 sm:$0xff]   ;;  %v3698_v8 = vld [vmem:[%s4227_s26 + $0x7cc] ss:$16 sps:$4 sm:$0xff]  }
 0x158   : > { %2054 = vmatpush1.bf16.msra.mxu0 %v3603_v9  ;;  %2226 = vmatpush1.bf16.msra.mxu1 %v3606_v10  ;;  %v3693_v9 = vld [vmem:[%s4227_s26 + $0x7c0] ss:$16 sps:$4 sm:$0xff]   ;;  %v3696_v10 = vld [vmem:[%s4227_s26 + $0x7c8] ss:$16 sps:$4 sm:$0xff]  }
 0x159   : > { %2066 = vmatprep.subr.bf16.mxu0 %v3611_v11  ;;  %2238 = vmatprep.subr.bf16.mxu1 %v3614_v12  ;;  %v3701_v11 = vld [vmem:[%s4227_s26 + $0x7e4] ss:$16 sps:$4 sm:$0xff]   ;;  %v3704_v12 = vld [vmem:[%s4227_s26 + $0x7ec] ss:$16 sps:$4 sm:$0xff]  }
 0x15b   : > { %2056 = vmatmul.mubr.bf16.vlgmr.msra.gmra.mrb[0].mxu0 %v2861_v18  ;;  %2228 = vmatmul.mubr.bf16.vlgmr.msra.gmra.mrb[0].mxu1 %v2861_v18  ;;  %v3705_v18 = vld [vmem:[%s4238_s29 + $0x40] sm:$0xff]  }
 0x15c   : > { %2067 = vmatpush1.bf16.msra.mxu0 %v3609_v13  ;;  %2239 = vmatpush1.bf16.msra.mxu1 %v3612_v16  ;;  %v3699_v13 = vld [vmem:[%s4227_s26 + $0x7e0] ss:$16 sps:$4 sm:$0xff]   ;;  %v3702_v16 = vld [vmem:[%s4227_s26 + $0x7e8] ss:$16 sps:$4 sm:$0xff]  }
 0x15d   : > { %2068 = vmatprep.subr.bf16.mxu0 %v3617_v20  ;;  %2240 = vmatprep.subr.bf16.mxu1 %v3620_v21  ;;  %v3706_v20 = vld [vmem:[%s4238_s29 + $0xc0] sm:$0xff]   ;;  %v2863_v21 = vcombine.low %v4454_v17, %v4458_v19  ;;  %v3712_v17 = vld [vmem:[%s4238_s29 + $0x88] sm:$0xff]   ;;  %v3713_v19 = vld [vmem:[%s4238_s29 + $0x50] sm:$0xff]  }
 0x15e   : > { %2098 = vmatprep.mubr.bf16.mxu0 %v2864_v23  ;;  %2270 = vmatprep.mubr.bf16.mxu1 %v2864_v23  ;;  %v3708_v23 = vld [vmem:[%s4238_s29 + $0x80] sm:$0xff]  }
 0x160   : > { %2069 = vmatpush1.bf16.msra.mxu0 %v3615_v22  ;;  %2241 = vmatpush1.bf16.msra.mxu1 %v3618_v14  ;;  %v3707_v22 = vld [vmem:[%s4238_s29] sm:$0xff]   ;;  %v3709_v14 = vld [vmem:[%s4238_s29 + $0x48] sm:$0xff]  }
 0x161   : > { %2070 = vmatprep.subr.bf16.mxu0 %v3623_v15  ;;  %2242 = vmatprep.subr.bf16.mxu1 %v3626_v24  ;;  %v3710_v15 = vld [vmem:[%s4238_s29 + $0xc8] sm:$0xff]  }
 0x162   : > { %v3711_v24 = vld [vmem:[%s4238_s29 + $0x8] sm:$0xff]  }
 0x164   : > { %2071 = vmatpush1.bf16.msra.mxu0 %v3621_v25  ;;  %2243 = vmatpush1.bf16.msra.mxu1 %v3624_v26  ;;  %v3714_v25 = vld [vmem:[%s4238_s29 + $0xd0] sm:$0xff]  }
 0x165   : > { %2072 = vmatprep.subr.bf16.mxu0 %v3629_v27  ;;  %2244 = vmatprep.subr.bf16.mxu1 %v3632_v28  ;;  %v3715_v26 = vld [vmem:[%s4238_s29 + $0x10] sm:$0xff]   ;;  %v3717_v28 = vld [vmem:[%s4238_s29 + $0x58] sm:$0xff]  }
 0x166   : > { %v3716_v27 = vld [vmem:[%s4238_s29 + $0x90] sm:$0xff]  }
 0x168   : > { %2073 = vmatpush1.bf16.msra.mxu0 %v3627_v29  ;;  %2245 = vmatpush1.bf16.msra.mxu1 %v3630_v30  ;;  %v3718_v29 = vld [vmem:[%s4238_s29 + $0xd8] sm:$0xff]  }
 0x169   : > { %2074 = vmatprep.subr.bf16.mxu0 %v3635_v31  ;;  %2246 = vmatprep.subr.bf16.mxu1 %v3638_v32  ;;  %v3719_v30 = vld [vmem:[%s4238_s29 + $0x18] sm:$0xff]   ;;  %v3721_v32 = vld [vmem:[%s4238_s29 + $0x60] sm:$0xff]  }
 0x16a   : > { %v3720_v31 = vld [vmem:[%s4238_s29 + $0x98] sm:$0xff]  }
 0x16c   : > { %2075 = vmatpush1.bf16.msra.mxu0 %v3633_v33  ;;  %2247 = vmatpush1.bf16.msra.mxu1 %v3636_v34  ;;  %v3722_v33 = vld [vmem:[%s4238_s29 + $0xe0] sm:$0xff]  }
 0x16d   : > { %2076 = vmatprep.subr.bf16.mxu0 %v3641_v35  ;;  %2248 = vmatprep.subr.bf16.mxu1 %v3644_v36  ;;  %v3723_v34 = vld [vmem:[%s4238_s29 + $0x20] sm:$0xff]   ;;  %v3725_v36 = vld [vmem:[%s4238_s29 + $0x68] sm:$0xff]  }
 0x16e   : > { %v3724_v35 = vld [vmem:[%s4238_s29 + $0xa0] sm:$0xff]  }
 0x170   : > { %2077 = vmatpush1.bf16.msra.mxu0 %v3639_v37  ;;  %2249 = vmatpush1.bf16.msra.mxu1 %v3642_v38  ;;  %v3726_v37 = vld [vmem:[%s4238_s29 + $0xe8] sm:$0xff]  }
 0x171   : > { %2078 = vmatprep.subr.bf16.mxu0 %v3647_v39  ;;  %2250 = vmatprep.subr.bf16.mxu1 %v3650_v40  ;;  %v3727_v38 = vld [vmem:[%s4238_s29 + $0x28] sm:$0xff]   ;;  %v3729_v40 = vld [vmem:[%s4238_s29 + $0x70] sm:$0xff]  }
 0x172   : > { %v3728_v39 = vld [vmem:[%s4238_s29 + $0xa8] sm:$0xff]  }
 0x174   : > { %2079 = vmatpush1.bf16.msra.mxu0 %v3645_v41  ;;  %2251 = vmatpush1.bf16.msra.mxu1 %v3648_v42  ;;  %v3730_v41 = vld [vmem:[%s4238_s29 + $0xf0] sm:$0xff]  }
 0x175   : > { %2080 = vmatprep.subr.bf16.mxu0 %v3653_v43  ;;  %2252 = vmatprep.subr.bf16.mxu1 %v3656_v44  ;;  %v3731_v42 = vld [vmem:[%s4238_s29 + $0x30] sm:$0xff]   ;;  %v3733_v44 = vld [vmem:[%s4238_s29 + $0x78] sm:$0xff]  }
 0x176   : > { %v3732_v43 = vld [vmem:[%s4238_s29 + $0xb0] sm:$0xff]  }
 0x178   : > { %2081 = vmatpush1.bf16.msra.mxu0 %v3651_v45  ;;  %2253 = vmatpush1.bf16.msra.mxu1 %v3654_v46  ;;  %v3734_v45 = vld [vmem:[%s4238_s29 + $0xf8] sm:$0xff]  }
 0x179   : > { %2082 = vmatprep.subr.bf16.mxu0 %v3659_v47  ;;  %2254 = vmatprep.subr.bf16.mxu1 %v3662_v48  ;;  %v3735_v46 = vld [vmem:[%s4238_s29 + $0x38] sm:$0xff]   ;;  %v2310_v48 = vlaneseq }
 0x17a   : > { %v3736_v47 = vld [vmem:[%s4238_s29 + $0xb8] sm:$0xff]  }
 0x17c   : > { %2083 = vmatpush1.bf16.msra.mxu0 %v3657_v49  ;;  %2255 = vmatpush1.bf16.msra.mxu1 %v3660_v50  ;;  %v2311_v49 = vshrl.u32 %v2310_v48, 7 }
 0x17d   : > { %2084 = vmatprep.subr.bf16.mxu0 %v3665_v51  ;;  %2256 = vmatprep.subr.bf16.mxu1 %v3668_v52  ;;  %v2308_v52 = vld [vmem:[%s4235_s5] sm:$0xf] }
 0x17e   : > { %v2312_v50 = vsub.s32 0, %v2311_v49  ;;  %v2320_v51 = vsub.s32 2, %v2311_v49 }
 0x180   : > { %2085 = vmatpush1.bf16.msra.mxu0 %v3663_v53  ;;  %2257 = vmatpush1.bf16.msra.mxu1 %v3666_v54  ;;  %v2316_v53 = vsub.s32 1, %v2311_v49  ;;  %v2324_v54 = vsub.s32 3, %v2311_v49 }
 0x181   : > { %2086 = vmatprep.subr.bf16.mxu0 %v3671_v55  ;;  %2258 = vmatprep.subr.bf16.mxu1 %v3674_v56  ;;  %v2313_v55 = vrot.slane %v2308_v52, %v2312_v50  ;;  %v2321_v56 = vrot.slane %v2308_v52, %v2320_v51 }
 0x184   : > { %2087 = vmatpush1.bf16.msra.mxu0 %v3669_v57  ;;  %2259 = vmatpush1.bf16.msra.mxu1 %v3672_v58 }
 0x185   : > { %2088 = vmatprep.subr.bf16.mxu0 %v3677_v59  ;;  %2260 = vmatprep.subr.bf16.mxu1 %v3680_v60  ;;  %v2317_v59 = vrot.slane %v2308_v52, %v2316_v53  ;;  %v2325_v60 = vrot.slane %v2308_v52, %v2324_v54 }
 0x188   : > { %2089 = vmatpush1.bf16.msra.mxu0 %v3675_v61  ;;  %2261 = vmatpush1.bf16.msra.mxu1 %v3678_v62 }
 0x189   : > { %2090 = vmatprep.subr.bf16.mxu0 %v3683_v63  ;;  %2262 = vmatprep.subr.bf16.mxu1 %v3686_v0 }
 0x18c   : > { %2091 = vmatpush1.bf16.msra.mxu0 %v3681_v1  ;;  %2263 = vmatpush1.bf16.msra.mxu1 %v3684_v2 }
 0x18d   : > { %2092 = vmatprep.subr.bf16.mxu0 %v3689_v3  ;;  %2264 = vmatprep.subr.bf16.mxu1 %v3692_v4 }
 0x190   : > { %2093 = vmatpush1.bf16.msra.mxu0 %v3687_v5  ;;  %2265 = vmatpush1.bf16.msra.mxu1 %v3690_v6 }
 0x191   : > { %2094 = vmatprep.subr.bf16.mxu0 %v3695_v7  ;;  %2266 = vmatprep.subr.bf16.mxu1 %v3698_v8 }
 0x194   : > { %2095 = vmatpush1.bf16.msra.mxu0 %v3693_v9  ;;  %2267 = vmatpush1.bf16.msra.mxu1 %v3696_v10 }
 0x195   : > { %2096 = vmatprep.subr.bf16.mxu0 %v3701_v11  ;;  %2268 = vmatprep.subr.bf16.mxu1 %v3704_v12 }
 0x198   : > { %2097 = vmatpush1.bf16.msra.mxu0 %v3699_v13  ;;  %2269 = vmatpush1.bf16.msra.mxu1 %v3702_v16 }
 0x199   : > { %3162 = vmatprep.subr.bf16.mxu0 %v3705_v18  ;;  %3184 = vmatprep.subr.bf16.mxu1 %v3706_v20 }
 0x19b   : > { %2099 = vmatmul.mubr.bf16.vlgmr.msra.gmra.mrb[0].mxu0 %v2863_v21  ;;  %2271 = vmatmul.mubr.bf16.vlgmr.msra.gmra.mrb[0].mxu1 %v2863_v21 }
 0x19c   : > { %3163 = vmatpush3.bf16.msra.mxu0 %v3707_v22  ;;  %3185 = vmatpush3.bf16.msra.mxu1 %v3708_v23 }
 0x19d   : > { %3164 = vmatprep.subr.bf16.mxu0 %v3709_v14  ;;  %3186 = vmatprep.subr.bf16.mxu1 %v3710_v15 }
 0x1a0   : > { %3165 = vmatpush3.bf16.msra.mxu0 %v3711_v24  ;;  %3187 = vmatpush3.bf16.msra.mxu1 %v3712_v17 }
 0x1a1   : > { %3166 = vmatprep.subr.bf16.mxu0 %v3713_v19  ;;  %3188 = vmatprep.subr.bf16.mxu1 %v3714_v25 }
 0x1a4   : > { %3167 = vmatpush3.bf16.msra.mxu0 %v3715_v26  ;;  %3189 = vmatpush3.bf16.msra.mxu1 %v3716_v27 }
 0x1a5   : > { %3168 = vmatprep.subr.bf16.mxu0 %v3717_v28  ;;  %3190 = vmatprep.subr.bf16.mxu1 %v3718_v29 }
 0x1a8   : > { %3169 = vmatpush3.bf16.msra.mxu0 %v3719_v30  ;;  %3191 = vmatpush3.bf16.msra.mxu1 %v3720_v31 }
 0x1a9   : > { %3170 = vmatprep.subr.bf16.mxu0 %v3721_v32  ;;  %3192 = vmatprep.subr.bf16.mxu1 %v3722_v33 }
 0x1ac   : > { %3171 = vmatpush3.bf16.msra.mxu0 %v3723_v34  ;;  %3193 = vmatpush3.bf16.msra.mxu1 %v3724_v35 }
 0x1ad   : > { %3172 = vmatprep.subr.bf16.mxu0 %v3725_v36  ;;  %3194 = vmatprep.subr.bf16.mxu1 %v3726_v37 }
 0x1b0   : > { %3173 = vmatpush3.bf16.msra.mxu0 %v3727_v38  ;;  %3195 = vmatpush3.bf16.msra.mxu1 %v3728_v39 }
 0x1b1   : > { %3174 = vmatprep.subr.bf16.mxu0 %v3729_v40  ;;  %3196 = vmatprep.subr.bf16.mxu1 %v3730_v41 }
 0x1b4   : > { %3175 = vmatpush3.bf16.msra.mxu0 %v3731_v42  ;;  %3197 = vmatpush3.bf16.msra.mxu1 %v3732_v43 }
 0x1b5   : > { %3176 = vmatprep.subr.bf16.mxu0 %v3733_v44  ;;  %3198 = vmatprep.subr.bf16.mxu1 %v3734_v45 }
 0x1b8   : > { %3177 = vmatpush3.bf16.msra.mxu0 %v3735_v46  ;;  %3199 = vmatpush3.bf16.msra.mxu1 %v3736_v47 }
 0x26e   : > { %v2100_v57 = vpop.f32.mrb[0].mxu0  ;;  %v2272_v58 = vpop.f32.mrb[0].mxu1 }
 0x26f   : > { %v2102_v61 = vpop.f32.mrb[1].mxu0  ;;  %v2274_v62 = vpop.f32.mrb[1].mxu1  ;;  %v2330_v1 = vadd.f32 %v2313_v55, %v2100_v57  ;;  %v2332_v2 = vadd.f32 %v2321_v56, %v2272_v58 }
 0x270   : > { %v2104_v63 = vpop.f32.mrb[2].mxu0  ;;  %v2276_v0 = vpop.f32.mrb[2].mxu1  ;;  %v2331_v7 = vadd.f32 %v2317_v59, %v2102_v61  ;;  %v2333_v8 = vadd.f32 %v2325_v60, %v2274_v62 }
 0x271   : > { %v2334_v3 = vadd.f32 %v2313_v55, %v2104_v63  ;;  %v2336_v4 = vadd.f32 %v2321_v56, %v2276_v0  ;;  %v2106_v5 = vpop.f32.mrb[3].mxu0  ;;  %v2278_v6 = vpop.f32.mrb[3].mxu1 }
 0x272   : > { %v2335_v9 = vadd.f32 %v2317_v59, %v2106_v5  ;;  %v2337_v10 = vadd.f32 %v2325_v60, %v2278_v6 }
 0x273   : > { %v2338_v11 = vpack.c.bf16 %v2334_v3, %v2330_v1  ;;  %v2340_v12 = vpack.c.bf16 %v2336_v4, %v2332_v2 }
 0x274   : > { %v2339_v13 = vpack.c.bf16 %v2335_v9, %v2331_v7  ;;  %v2341_v16 = vpack.c.bf16 %v2337_v10, %v2333_v8 }
 0x276   : > { %2630 = vmatprep.mubr.bf16.mxu0 %v2339_v13  ;;  %2671 = vmatprep.mubr.bf16.mxu1 %v2341_v16 }
 0x277   : > { %2631 = vmatmul.mubr.bf16.vlgmr.msra.gmra.mrb[4].mxu0 %v2338_v11  ;;  %2672 = vmatmul.mubr.bf16.vlgmr.msra.gmra.mrb[4].mxu1 %v2340_v12 }
 0x34a   : > { %v3178_v18 = vpop.f32.mrb[4].mxu0  ;;  %v3200_v20 = vpop.f32.mrb[4].mxu1 }
 0x34b   : > { %v3179_v21 = vpop.f32.mrb[5].mxu0  ;;  %v3201_v22 = vpop.f32.mrb[5].mxu1 }
 0x34c   : > { %v3180_v23 = vadd.f32 %v3179_v21, %v3178_v18  ;;  %v3202_v14 = vadd.f32 %v3201_v22, %v3200_v20  ;;  %v3181_v15 = vpop.f32.mrb[6].mxu0  ;;  %v3203_v24 = vpop.f32.mrb[6].mxu1 }
 0x34d   : > { %v3182_v17 = vpop.f32.mrb[7].mxu0  ;;  %v3204_v19 = vpop.f32.mrb[7].mxu1 }
 0x34e   : > { %v2674_v25 = vadd.f32 %v3202_v14, %v3180_v23  ;;  %v3183_v26 = vadd.f32 %v3182_v17, %v3181_v15  ;;  %v3205_v27 = vadd.f32 %v3204_v19, %v3203_v24 }
 0x350   : > { %2680 = vst [vmem:[%s322_s10] sm:$0xff] %v2674_v25  ;;  %v2677_v28 = vadd.f32 %v3205_v27, %v3183_v26 }
 0x352   : > { %2681 = vst [vmem:[%s322_s10 + $0x8] sm:$0xff] %v2677_v28 }
 0x353   : > { %3868 = shalt.err (!%p3865_p12)
}
 0x354   : > { %s3869_s12 = scalar_lea.hbm %s4564_s17, 256  ;;  %s3873_s26 = scalar_lea.hbm %s4617_s4, 512 }
 0x355   : > { %p3870_p0 = scmp.ne.s32.totalorder %s4564_s17, %s3869_s12  ;;  %p3874_p11 = scmp.lt.u32.totalorder %s4564_s17, %s4617_s4 }
 0x356   : > { %p3875_p1 = scmp.lt.u32.totalorder %s3873_s26, %s3869_s12  ;;  %p3877_p5 = scmp.lt.u32.totalorder %s3869_s12, %s4564_s17 }
 0x357   : > { %p3871_p3 = pnand %p3870_p0, %p4654_p10 }
 0x358   : > { %p3876_p9 = por %p3875_p1, %p3874_p11 }
 0x359   : > { %p3872_p2 = pneg %p3871_p3 }
 0x35a   : > { %p3878_p13 = por %p3877_p5, %p3876_p9 }
 0x35c   : > { %p3879_p4 = pnand %p3878_p13, %p3872_p2 }
 0x35e   : > { %3882 = shalt.err (!%p3879_p4)
}
 0x35f   : > { %s3958_s5 = smov 128   ;;  %s3959_s13 = smov 8  }
 0x360   : > { %3240 = dma.vmem_to_hbm [thread:$0]  (%p4654_p10), %s4559_s7, 256, %s4564_s17, %s2683_s27, %s3958_s5, %s3958_s5, %s3959_s13  }
 0x361 PF: > { %s4655_s29 = sld [smem:[#allocation17_spill]]  ;;  %s2711_s22 = sand.u32 1, %s3925_s15  }
 0x362   : > { %p4656_p7 = scmp.ne.s32.totalorder %s4644_s8, 0  ;;  %s2712_s10 = scalar_lea.sflag [#allocation5], %s2711_s22 }
 0x367   : > { %p4657_p6 = scmp.ge.s32.totalorder %s4655_s29, 2 }
 0x369   : > { %p3257_p8 = pnand %p4657_p6, %p4656_p7 }
 0x36b   : > { %3920 = dma.done.wait (!%p3257_p8), %s2712_s10, 256  }
 0x36c   : > { %3922 = vsyncadd (!%p3257_p8), %s2712_s10, 4294967040  ;;  %s24_s20 = sadd.s32 1, %s4655_s29   ;;  %s4658_s21 = sld [smem:[#allocation16_spill]] }
 0x36d   : > { %p21_p12 = scmp.ge.s32.totalorder %s24_s20, 4   ;;  %s4659_s17 = sld [smem:[#allocation19_spill]] }
 0x36e   : > { %s4660_s6 = sld [smem:[#allocation18_spill]]  ;;  %s4661_s15 = smov %s3929_s16 }
 0x36f   : > { %s4663_s18 = smov %s3941_s19  ;;  %23 = sbr.rel (!%p21_p12) target bundleno = 11 (0xb), region = 119 }
 0x372   : > { %s4662_s16 = smov %s4658_s21 }
 0x374   : > { %s4664_s19 = smov %s4660_s6 }
 0x376   :  { %2717 = vsyncpa [#allocation4], 1 }
 0x377   :  { %2719 = vsyncpa [#allocation4 + $0x1], 1 }
 0x378   :  { %2720 = vsyncpa [#allocation7], 1 }
 0x379   :  { %2722 = vsyncpa [#allocation7 + $0x1], 1 }
 0x37a   :  { %2723 = vsyncpa [#allocation10], 1 }
 0x37b   :  { %2725 = vsyncpa [#allocation10 + $0x1], 1 }
 0x37c   :  { %2726 = vsyncpa [#allocation5], 1 }
 0x37d   :  { %2728 = vsyncpa [#allocation5 + $0x1], 1 }

</bundles_post_ra>
